<compile_context>
chip_gen: v6e
topology: v6e:2x2x1
jax: 0.10.0
libtpu: 0.0.40
codegen_flags: <defaults>
</compile_context>

<pallas_src>
import jax
import jax.numpy as jnp
from jax import lax
from jax.experimental import pallas as pl
from jax.experimental.pallas import tpu as pltpu

EPS = 1e-5


# ----------------------------- fused layer kernel --------------------------- #

def _dense_layer_kernel(x_ref, s1_ref, b1_ref, w1_ref, b2_ref, w2_ref,
                        o_ref, pad_ref, col_ref):
    """One DenseNet conv_block, fully fused, for a single batch item.

    x_ref  : (1, H, W, Cbuf)   f32  running feature buffer (trailing channels 0)
    s1_ref : (1, Cbuf)         f32  BN1 folded scale (0 for unused channels)
    b1_ref : (1, Cbuf)         f32  BN1 folded bias  (0 for unused channels)
    w1_ref : (Cbuf, inter)     bf16 1x1 weights with BN2 scale folded in
    b2_ref : (1, inter)        f32  BN2 folded bias
    w2_ref : (9*inter, G)      bf16 3x3 weights, tap-major im2col layout
    o_ref  : (1, H*W, G)       f32  new features produced by this layer
    pad_ref: (H+2, W+2, inter) f32  VMEM scratch: zero-padded activation
    col_ref: (H*W, 9*inter)    f32  VMEM scratch: im2col slab
    """
    _, H, W, Cbuf = x_ref.shape
    inter = w1_ref.shape[1]
    G = o_ref.shape[2]

    # BN1 + ReLU (f32 elementwise), then 1x1 conv (bf16 MXU) with BN2 scale
    # already folded into w1; add BN2 bias and ReLU in the epilogue.
    x2d = x_ref[0].reshape(H * W, Cbuf)
    a1 = jnp.maximum(x2d * s1_ref[...] + b1_ref[...], 0.0)
    y = jnp.dot(a1.astype(jnp.bfloat16), w1_ref[...],
                preferred_element_type=jnp.float32)
    a2 = jnp.maximum(y + b2_ref[...], 0.0)

    # Zero-pad spatially inside VMEM (no HBM round trip for the padded copy).
    pad_ref[...] = jnp.zeros_like(pad_ref)
    pad_ref[1:H + 1, 1:W + 1, :] = a2.reshape(H, W, inter)

    # im2col: pack the nine shifted windows into one (H*W, 9*inter) slab so the
    # 3x3 conv becomes a single deep (K = 9*inter) MXU matmul.
    for tap in range(9):
        dh, dw = tap // 3, tap % 3
        patch = pad_ref[dh:dh + H, dw:dw + W, :].reshape(H * W, inter)
        col_ref[:, tap * inter:(tap + 1) * inter] = patch

    out = jnp.dot(col_ref[...].astype(jnp.bfloat16), w2_ref[...],
                  preferred_element_type=jnp.float32)
    o_ref[...] = out.reshape(1, H * W, G)


def _dense_layer(buf, s1, b1, w1f, b2, w2m):
    """Run the fused conv_block over the batch. Returns (N, H*W, growth) f32."""
    N, H, W, Cbuf = buf.shape
    inter = w1f.shape[1]
    G = w2m.shape[1]
    return pl.pallas_call(
        _dense_layer_kernel,
        out_shape=jax.ShapeDtypeStruct((N, H * W, G), jnp.float32),
        grid_spec=pltpu.PrefetchScalarGridSpec(
            num_scalar_prefetch=0,
            grid=(N,),
            in_specs=[
                pl.BlockSpec((1, H, W, Cbuf), lambda n: (n, 0, 0, 0)),
                pl.BlockSpec((1, Cbuf), lambda n: (0, 0)),
                pl.BlockSpec((1, Cbuf), lambda n: (0, 0)),
                pl.BlockSpec((Cbuf, inter), lambda n: (0, 0)),
                pl.BlockSpec((1, inter), lambda n: (0, 0)),
                pl.BlockSpec((9 * inter, G), lambda n: (0, 0)),
            ],
            out_specs=pl.BlockSpec((1, H * W, G), lambda n: (n, 0, 0)),
            scratch_shapes=[
                pltpu.VMEM((H + 2, W + 2, inter), jnp.float32),
                pltpu.VMEM((H * W, 9 * inter), jnp.float32),
            ],
        ),
        compiler_params=pltpu.CompilerParams(
            dimension_semantics=("parallel",),
        ),
    )(buf, s1, b1, w1f, b2, w2m)


# ------------------------------ forward pass -------------------------------- #

def dense_block_forward(x_nchw, params):
    """NCHW in -> NCHW out; feature maps grow by growth_rate per layer."""
    growth = params[0]["w2"].shape[0]
    x = jnp.transpose(x_nchw, (0, 2, 3, 1)).astype(jnp.float32)        # NHWC
    N, H, W, C0 = x.shape
    c_final = C0 + len(params) * growth

    # Preallocated feature buffer; trailing (not-yet-written) channels are zero.
    buf = jnp.pad(x, ((0, 0), (0, 0), (0, 0), (0, c_final - C0)))

    c = C0
    for p in params:
        inter = p["w1"].shape[0]
        # Fold both BNs into affines; fold BN2's scale into the 1x1 weights.
        s1 = p["bn1_gamma"] / jnp.sqrt(p["bn1_var"] + EPS)
        b1 = p["bn1_beta"] - p["bn1_mean"] * s1
        s2 = p["bn2_gamma"] / jnp.sqrt(p["bn2_var"] + EPS)
        b2 = p["bn2_beta"] - p["bn2_mean"] * s2
        w1f = jnp.transpose(p["w1"][:, :, 0, 0], (1, 0)) * s2[None, :]  # (c, inter)

        # Zero-pad channel-dependent params to the static buffer width so the
        # unused (zero) buffer channels contribute exactly nothing.
        s1_full = jnp.zeros((1, c_final), jnp.float32).at[0, :c].set(s1)
        b1_full = jnp.zeros((1, c_final), jnp.float32).at[0, :c].set(b1)
        w1_full = jnp.zeros((c_final, inter), jnp.float32).at[:c, :].set(w1f)

        # 3x3 weights in tap-major im2col layout: OIHW -> HWIO -> (9*in, out)
        w2m = jnp.transpose(p["w2"], (2, 3, 1, 0)).reshape(9 * inter, growth)

        new = _dense_layer(buf, s1_full, b1_full,
                           w1_full.astype(jnp.bfloat16),
                           b2.reshape(1, inter),
                           w2m.astype(jnp.bfloat16))
        buf = lax.dynamic_update_slice(buf, new.reshape(N, H, W, growth),
                                       (0, 0, 0, c))
        c += growth
    return jnp.transpose(buf, (0, 3, 1, 2))                            # NCHW


dense_block_forward_jit = jax.jit(dense_block_forward)


# ------------------------------ Dense_Block --------------------------------- #

def init_dense_block_params(key, nb_layers, nb_filter, growth_rate):
    """Deterministic parameter init (PyTorch weight shapes: conv = OIHW)."""
    params = []
    c = nb_filter
    inter = 4 * growth_rate
    for _ in range(nb_layers):
        key, k1, k2, k3, k4, k5, k6, k7, k8 = jax.random.split(key, 9)
        p = dict(
            bn1_gamma=1.0 + 0.1 * jax.random.normal(k1, (c,), jnp.float32),
            bn1_beta=0.1 * jax.random.normal(k2, (c,), jnp.float32),
            bn1_mean=0.05 * jax.random.normal(k7, (c,), jnp.float32),
            bn1_var=1.0 + 0.1 * jax.random.uniform(k8, (c,), jnp.float32),
            w1=jax.random.normal(k3, (inter, c, 1, 1), jnp.float32)
               * (1.0 / jnp.sqrt(float(c))),
            bn2_gamma=1.0 + 0.1 * jax.random.normal(k4, (inter,), jnp.float32),
            bn2_beta=0.1 * jax.random.normal(k5, (inter,), jnp.float32),
            bn2_mean=jnp.zeros((inter,), jnp.float32),
            bn2_var=jnp.ones((inter,), jnp.float32),
            w2=jax.random.normal(k6, (growth_rate, inter, 3, 3), jnp.float32)
               * (1.0 / jnp.sqrt(9.0 * inter)),
        )
        params.append(p)
        c += growth_rate
    return params


class DenseBlockPallas:
    """Pallas equivalent of Dense_Block (inference semantics)."""

    def __init__(self, key, stage, nb_layers, nb_filter, growth_rate,
                 dropout_rate=None, weight_decay=1e-4, grow_nb_filters=True):
        del stage, weight_decay
        self.nb_layers = nb_layers
        self.growth_rate = growth_rate
        self.grow_nb_filters = grow_nb_filters
        self.dropout_rate = dropout_rate
        # TODO(synk): dropout_rate is not applied (default None; identity at inference).
        self.params = init_dense_block_params(key, nb_layers, nb_filter, growth_rate)
        self.nb_filter = nb_filter + (nb_layers * growth_rate if grow_nb_filters
                                      else 0)

    def __call__(self, x_nchw):
        return dense_block_forward_jit(x_nchw, self.params)


# ------------------------------- reference ----------------------------------- #

def ref_forward(x_nchw, params):
    """Plain-JAX reference with the same bf16-at-the-dot precision policy."""
    x = jnp.transpose(x_nchw, (0, 2, 3, 1)).astype(jnp.float32)
    concat = x
    for p in params:
        s1 = p["bn1_gamma"] / jnp.sqrt(p["bn1_var"] + EPS)
        b1 = p["bn1_beta"] - p["bn1_mean"] * s1
        a1 = jax.nn.relu(concat * s1 + b1)
        s2 = p["bn2_gamma"] / jnp.sqrt(p["bn2_var"] + EPS)
        b2 = p["bn2_beta"] - p["bn2_mean"] * s2
        w1f = p["w1"][:, :, 0, 0].T * s2[None, :]          # BN2 scale folded
        y = jnp.einsum("nhwc,ci->nhwi", a1.astype(jnp.bfloat16),
                       w1f.astype(jnp.bfloat16),
                       preferred_element_type=jnp.float32)
        a2 = jax.nn.relu(y + b2)
        f = lax.conv_general_dilated(
            a2.astype(jnp.bfloat16),
            jnp.transpose(p["w2"], (2, 3, 1, 0)).astype(jnp.bfloat16),
            window_strides=(1, 1), padding="SAME",
            dimension_numbers=("NHWC", "HWIO", "NHWC"),
            preferred_element_type=jnp.float32)
        concat = jnp.concatenate([concat, f], axis=-1)
    return jnp.transpose(concat, (0, 3, 1, 2))


# --------------------------------- main --------------------------------------- #

if __name__ == "__main__":
    key = jax.random.PRNGKey(0)
    kx, kp = jax.random.split(key)

    N, C, H, W = 2, 4, 16, 16          # NCHW input, like PyTorch
    nb_layers, nb_filter, growth_rate = 3, C, 8

    x = jax.random.normal(kx, (N, C, H, W), jnp.float32)

    block = DenseBlockPallas(kp, stage=1, nb_layers=nb_layers,
                             nb_filter=nb_filter, growth_rate=growth_rate)

    out = jax.block_until_ready(block(x))

    expected_c = nb_filter + nb_layers * growth_rate
    assert out.shape == (N, expected_c, H, W), out.shape

    ref = jax.block_until_ready(ref_forward(x, block.params))
    max_err = float(jnp.max(jnp.abs(out - ref)))
    assert jnp.allclose(out, ref, atol=1e-2, rtol=1e-2), max_err

    print("KERNEL_OK")
</pallas_src>

<mosaic_0001>
module attributes {stable_mosaic.version = 11 : i64} {
  func.func @_dense_layer_kernel(%arg0: i32, %arg1: memref<1x16x16x28xf32, #tpu.memory_space<vmem>>, %arg2: memref<1x28xf32, #tpu.memory_space<vmem>>, %arg3: memref<1x28xf32, #tpu.memory_space<vmem>>, %arg4: memref<28x32xbf16, #tpu.memory_space<vmem>>, %arg5: memref<1x32xf32, #tpu.memory_space<vmem>>, %arg6: memref<288x8xbf16, #tpu.memory_space<vmem>>, %arg7: memref<1x256x8xf32, #tpu.memory_space<vmem>>, %arg8: memref<18x18x32xf32, #tpu.memory_space<vmem>>, %arg9: memref<256x288xf32, #tpu.memory_space<vmem>>) attributes {dimension_semantics = [#tpu.dimension_semantics<parallel>], iteration_bounds = array<i64: 2>, scalar_prefetch = 0 : i64, scratch_operands = 2 : i64, tpu.core_type = #tpu.core_type<tc>, window_params = [{transform_indices = @transform_0, window_bounds = array<i64: 1, 16, 16, 28>}, {pipeline_mode = #tpu.pipeline_mode<synchronous>, transform_indices = @transform_1, window_bounds = array<i64: 1, 28>}, {pipeline_mode = #tpu.pipeline_mode<synchronous>, transform_indices = @transform_2, window_bounds = array<i64: 1, 28>}, {pipeline_mode = #tpu.pipeline_mode<synchronous>, transform_indices = @transform_3, window_bounds = array<i64: 28, 32>}, {pipeline_mode = #tpu.pipeline_mode<synchronous>, transform_indices = @transform_4, window_bounds = array<i64: 1, 32>}, {pipeline_mode = #tpu.pipeline_mode<synchronous>, transform_indices = @transform_5, window_bounds = array<i64: 288, 8>}, {transform_indices = @transform_6, window_bounds = array<i64: 1, 256, 8>}]} {
    %c0 = arith.constant 0 : index
    %c0_0 = arith.constant 0 : index
    %c0_1 = arith.constant 0 : index
    %c0_2 = arith.constant 0 : index
    %0 = vector.load %arg1[%c0, %c0_0, %c0_1, %c0_2] : memref<1x16x16x28xf32, #tpu.memory_space<vmem>>, vector<1x16x16x28xf32>
    %1 = vector.shape_cast %0 : vector<1x16x16x28xf32> to vector<16x16x28xf32>
    %2 = vector.shape_cast %1 : vector<16x16x28xf32> to vector<256x28xf32>
    %c0_3 = arith.constant 0 : index
    %c0_4 = arith.constant 0 : index
    %3 = vector.load %arg2[%c0_3, %c0_4] : memref<1x28xf32, #tpu.memory_space<vmem>>, vector<1x28xf32>
    %4 = vector.broadcast %3 : vector<1x28xf32> to vector<256x28xf32>
    %5 = arith.mulf %2, %4 : vector<256x28xf32>
    %c0_5 = arith.constant 0 : index
    %c0_6 = arith.constant 0 : index
    %6 = vector.load %arg3[%c0_5, %c0_6] : memref<1x28xf32, #tpu.memory_space<vmem>>, vector<1x28xf32>
    %7 = vector.broadcast %6 : vector<1x28xf32> to vector<256x28xf32>
    %8 = arith.addf %5, %7 : vector<256x28xf32>
    %cst = arith.constant 0.000000e+00 : f32
    %9 = vector.broadcast %cst : f32 to vector<256x28xf32>
    %10 = arith.maximumf %8, %9 : vector<256x28xf32>
    %11 = arith.truncf %10 : vector<256x28xf32> to vector<256x28xbf16>
    %c0_7 = arith.constant 0 : index
    %c0_8 = arith.constant 0 : index
    %12 = vector.load %arg4[%c0_7, %c0_8] : memref<28x32xbf16, #tpu.memory_space<vmem>>, vector<28x32xbf16>
    %cst_9 = arith.constant dense<0.000000e+00> : vector<256x32xf32>
    %13 = tpu.matmul %11, %12, %cst_9 {dimension_numbers = #tpu.dot_dimension_numbers<[1], [0], [0], [1], [0, 0, 1, 1], [], []>} : vector<256x28xbf16>, vector<28x32xbf16>, vector<256x32xf32> -> vector<256x32xf32>
    %c0_10 = arith.constant 0 : index
    %c0_11 = arith.constant 0 : index
    %14 = vector.load %arg5[%c0_10, %c0_11] : memref<1x32xf32, #tpu.memory_space<vmem>>, vector<1x32xf32>
    %15 = vector.broadcast %14 : vector<1x32xf32> to vector<256x32xf32>
    %16 = arith.addf %13, %15 : vector<256x32xf32>
    %cst_12 = arith.constant 0.000000e+00 : f32
    %17 = vector.broadcast %cst_12 : f32 to vector<256x32xf32>
    %18 = arith.maximumf %16, %17 : vector<256x32xf32>
    %cst_13 = arith.constant 0.000000e+00 : f32
    %19 = vector.broadcast %cst_13 : f32 to vector<18x18x32xf32>
    %c0_14 = arith.constant 0 : index
    %c0_15 = arith.constant 0 : index
    %c0_16 = arith.constant 0 : index
    %20 = vector.load %arg8[%c0_14, %c0_15, %c0_16] : memref<18x18x32xf32, #tpu.memory_space<vmem>>, vector<18x18x32xf32>
    tpu.vector_store %arg8[%c0_14, %c0_15, %c0_16], %19 {strides = array<i32>} : memref<18x18x32xf32, #tpu.memory_space<vmem>>, vector<18x18x32xf32>,
    %21 = vector.shape_cast %18 : vector<256x32xf32> to vector<16x16x32xf32>
    %c1 = arith.constant 1 : index
    %c1_17 = arith.constant 1 : index
    %c0_18 = arith.constant 0 : index
    %22 = vector.load %arg8[%c1, %c1_17, %c0_18] : memref<18x18x32xf32, #tpu.memory_space<vmem>>, vector<16x16x32xf32>
    tpu.vector_store %arg8[%c1, %c1_17, %c0_18], %21 {strides = array<i32>} : memref<18x18x32xf32, #tpu.memory_space<vmem>>, vector<16x16x32xf32>,
    %c0_19 = arith.constant 0 : index
    %c0_20 = arith.constant 0 : index
    %c0_21 = arith.constant 0 : index
    %23 = vector.load %arg8[%c0_19, %c0_20, %c0_21] : memref<18x18x32xf32, #tpu.memory_space<vmem>>, vector<16x16x32xf32>
    %24 = vector.shape_cast %23 : vector<16x16x32xf32> to vector<256x32xf32>
    %c0_22 = arith.constant 0 : index
    %c0_23 = arith.constant 0 : index
    %25 = vector.load %arg9[%c0_22, %c0_23] : memref<256x288xf32, #tpu.memory_space<vmem>>, vector<256x32xf32>
    tpu.vector_store %arg9[%c0_22, %c0_23], %24 {strides = array<i32>} : memref<256x288xf32, #tpu.memory_space<vmem>>, vector<256x32xf32>,
    %c0_24 = arith.constant 0 : index
    %c1_25 = arith.constant 1 : index
    %c0_26 = arith.constant 0 : index
    %26 = vector.load %arg8[%c0_24, %c1_25, %c0_26] : memref<18x18x32xf32, #tpu.memory_space<vmem>>, vector<16x16x32xf32>
    %27 = vector.shape_cast %26 : vector<16x16x32xf32> to vector<256x32xf32>
    %c0_27 = arith.constant 0 : index
    %c32 = arith.constant 32 : index
    %28 = vector.load %arg9[%c0_27, %c32] : memref<256x288xf32, #tpu.memory_space<vmem>>, vector<256x32xf32>
    tpu.vector_store %arg9[%c0_27, %c32], %27 {strides = array<i32>} : memref<256x288xf32, #tpu.memory_space<vmem>>, vector<256x32xf32>,
    %c0_28 = arith.constant 0 : index
    %c2 = arith.constant 2 : index
    %c0_29 = arith.constant 0 : index
    %29 = vector.load %arg8[%c0_28, %c2, %c0_29] : memref<18x18x32xf32, #tpu.memory_space<vmem>>, vector<16x16x32xf32>
    %30 = vector.shape_cast %29 : vector<16x16x32xf32> to vector<256x32xf32>
    %c0_30 = arith.constant 0 : index
    %c64 = arith.constant 64 : index
    %31 = vector.load %arg9[%c0_30, %c64] : memref<256x288xf32, #tpu.memory_space<vmem>>, vector<256x32xf32>
    tpu.vector_store %arg9[%c0_30, %c64], %30 {strides = array<i32>} : memref<256x288xf32, #tpu.memory_space<vmem>>, vector<256x32xf32>,
    %c1_31 = arith.constant 1 : index
    %c0_32 = arith.constant 0 : index
    %c0_33 = arith.constant 0 : index
    %32 = vector.load %arg8[%c1_31, %c0_32, %c0_33] : memref<18x18x32xf32, #tpu.memory_space<vmem>>, vector<16x16x32xf32>
    %33 = vector.shape_cast %32 : vector<16x16x32xf32> to vector<256x32xf32>
    %c0_34 = arith.constant 0 : index
    %c96 = arith.constant 96 : index
    %34 = vector.load %arg9[%c0_34, %c96] : memref<256x288xf32, #tpu.memory_space<vmem>>, vector<256x32xf32>
    tpu.vector_store %arg9[%c0_34, %c96], %33 {strides = array<i32>} : memref<256x288xf32, #tpu.memory_space<vmem>>, vector<256x32xf32>,
    %c1_35 = arith.constant 1 : index
    %c1_36 = arith.constant 1 : index
    %c0_37 = arith.constant 0 : index
    %35 = vector.load %arg8[%c1_35, %c1_36, %c0_37] : memref<18x18x32xf32, #tpu.memory_space<vmem>>, vector<16x16x32xf32>
    %36 = vector.shape_cast %35 : vector<16x16x32xf32> to vector<256x32xf32>
    %c0_38 = arith.constant 0 : index
    %c128 = arith.constant 128 : index
    %37 = vector.load %arg9[%c0_38, %c128] : memref<256x288xf32, #tpu.memory_space<vmem>>, vector<256x32xf32>
    tpu.vector_store %arg9[%c0_38, %c128], %36 {strides = array<i32>} : memref<256x288xf32, #tpu.memory_space<vmem>>, vector<256x32xf32>,
    %c1_39 = arith.constant 1 : index
    %c2_40 = arith.constant 2 : index
    %c0_41 = arith.constant 0 : index
    %38 = vector.load %arg8[%c1_39, %c2_40, %c0_41] : memref<18x18x32xf32, #tpu.memory_space<vmem>>, vector<16x16x32xf32>
    %39 = vector.shape_cast %38 : vector<16x16x32xf32> to vector<256x32xf32>
    %c0_42 = arith.constant 0 : index
    %c160 = arith.constant 160 : index
    %40 = vector.load %arg9[%c0_42, %c160] : memref<256x288xf32, #tpu.memory_space<vmem>>, vector<256x32xf32>
    tpu.vector_store %arg9[%c0_42, %c160], %39 {strides = array<i32>} : memref<256x288xf32, #tpu.memory_space<vmem>>, vector<256x32xf32>,
    %c2_43 = arith.constant 2 : index
    %c0_44 = arith.constant 0 : index
    %c0_45 = arith.constant 0 : index
    %41 = vector.load %arg8[%c2_43, %c0_44, %c0_45] : memref<18x18x32xf32, #tpu.memory_space<vmem>>, vector<16x16x32xf32>
    %42 = vector.shape_cast %41 : vector<16x16x32xf32> to vector<256x32xf32>
    %c0_46 = arith.constant 0 : index
    %c192 = arith.constant 192 : index
    %43 = vector.load %arg9[%c0_46, %c192] : memref<256x288xf32, #tpu.memory_space<vmem>>, vector<256x32xf32>
    tpu.vector_store %arg9[%c0_46, %c192], %42 {strides = array<i32>} : memref<256x288xf32, #tpu.memory_space<vmem>>, vector<256x32xf32>,
    %c2_47 = arith.constant 2 : index
    %c1_48 = arith.constant 1 : index
    %c0_49 = arith.constant 0 : index
    %44 = vector.load %arg8[%c2_47, %c1_48, %c0_49] : memref<18x18x32xf32, #tpu.memory_space<vmem>>, vector<16x16x32xf32>
    %45 = vector.shape_cast %44 : vector<16x16x32xf32> to vector<256x32xf32>
    %c0_50 = arith.constant 0 : index
    %c224 = arith.constant 224 : index
    %46 = vector.load %arg9[%c0_50, %c224] : memref<256x288xf32, #tpu.memory_space<vmem>>, vector<256x32xf32>
    tpu.vector_store %arg9[%c0_50, %c224], %45 {strides = array<i32>} : memref<256x288xf32, #tpu.memory_space<vmem>>, vector<256x32xf32>,
    %c2_51 = arith.constant 2 : index
    %c2_52 = arith.constant 2 : index
    %c0_53 = arith.constant 0 : index
    %47 = vector.load %arg8[%c2_51, %c2_52, %c0_53] : memref<18x18x32xf32, #tpu.memory_space<vmem>>, vector<16x16x32xf32>
    %48 = vector.shape_cast %47 : vector<16x16x32xf32> to vector<256x32xf32>
    %c0_54 = arith.constant 0 : index
    %c256 = arith.constant 256 : index
    %49 = vector.load %arg9[%c0_54, %c256] : memref<256x288xf32, #tpu.memory_space<vmem>>, vector<256x32xf32>
    tpu.vector_store %arg9[%c0_54, %c256], %48 {strides = array<i32>} : memref<256x288xf32, #tpu.memory_space<vmem>>, vector<256x32xf32>,
    %c0_55 = arith.constant 0 : index
    %c0_56 = arith.constant 0 : index
    %50 = vector.load %arg9[%c0_55, %c0_56] : memref<256x288xf32, #tpu.memory_space<vmem>>, vector<256x288xf32>
    %51 = arith.truncf %50 : vector<256x288xf32> to vector<256x288xbf16>
    %c0_57 = arith.constant 0 : index
    %c0_58 = arith.constant 0 : index
    %52 = vector.load %arg6[%c0_57, %c0_58] : memref<288x8xbf16, #tpu.memory_space<vmem>>, vector<288x8xbf16>
    %cst_59 = arith.constant dense<0.000000e+00> : vector<256x8xf32>
    %53 = tpu.matmul %51, %52, %cst_59 {dimension_numbers = #tpu.dot_dimension_numbers<[1], [0], [0], [1], [0, 0, 1, 1], [], []>} : vector<256x288xbf16>, vector<288x8xbf16>, vector<256x8xf32> -> vector<256x8xf32>
    %54 = vector.shape_cast %53 : vector<256x8xf32> to vector<1x256x8xf32>
    %c0_60 = arith.constant 0 : index
    %c0_61 = arith.constant 0 : index
    %c0_62 = arith.constant 0 : index
    %55 = vector.load %arg7[%c0_60, %c0_61, %c0_62] : memref<1x256x8xf32, #tpu.memory_space<vmem>>, vector<1x256x8xf32>
    tpu.vector_store %arg7[%c0_60, %c0_61, %c0_62], %54 {strides = array<i32>} : memref<1x256x8xf32, #tpu.memory_space<vmem>>, vector<1x256x8xf32>,
    return
  }
  func.func @transform_0(%arg0: i32) -> (i32, i32, i32, i32) {
    %c0_i32 = arith.constant 0 : i32
    %c0_i32_0 = arith.constant 0 : i32
    %c0_i32_1 = arith.constant 0 : i32
    %c0_i32_2 = arith.constant 0 : i32
    return %arg0, %c0_i32, %c0_i32_0, %c0_i32_1 : i32, i32, i32, i32
  }
  func.func @transform_1(%arg0: i32) -> (i32, i32) {
    %c0_i32 = arith.constant 0 : i32
    %c0_i32_0 = arith.constant 0 : i32
    %c0_i32_1 = arith.constant 0 : i32
    return %c0_i32, %c0_i32_0 : i32, i32
  }
  func.func @transform_2(%arg0: i32) -> (i32, i32) {
    %c0_i32 = arith.constant 0 : i32
    %c0_i32_0 = arith.constant 0 : i32
    %c0_i32_1 = arith.constant 0 : i32
    return %c0_i32, %c0_i32_0 : i32, i32
  }
  func.func @transform_3(%arg0: i32) -> (i32, i32) {
    %c0_i32 = arith.constant 0 : i32
    %c0_i32_0 = arith.constant 0 : i32
    %c0_i32_1 = arith.constant 0 : i32
    return %c0_i32, %c0_i32_0 : i32, i32
  }
  func.func @transform_4(%arg0: i32) -> (i32, i32) {
    %c0_i32 = arith.constant 0 : i32
    %c0_i32_0 = arith.constant 0 : i32
    %c0_i32_1 = arith.constant 0 : i32
    return %c0_i32, %c0_i32_0 : i32, i32
  }
  func.func @transform_5(%arg0: i32) -> (i32, i32) {
    %c0_i32 = arith.constant 0 : i32
    %c0_i32_0 = arith.constant 0 : i32
    %c0_i32_1 = arith.constant 0 : i32
    return %c0_i32, %c0_i32_0 : i32, i32
  }
  func.func @transform_6(%arg0: i32) -> (i32, i32, i32) {
    %c0_i32 = arith.constant 0 : i32
    %c0_i32_0 = arith.constant 0 : i32
    %c0_i32_1 = arith.constant 0 : i32
    return %arg0, %c0_i32, %c0_i32_0 : i32, i32, i32
  }
}

</mosaic_0001>

<bundles_post_ra>
// kernel: dense_block_forward.3
= control target key start
LH: loop header
LB: loop body
LE: loop exit
PB: predicated region body
PF: predicated region fallthrough
CT: control target
= control target key end

     0   :  { %s3246_s21 = smov 0   ;;  %s4634_s0 = inlined_call_operand.vmem [shape: f32[2,16,16,28], index: 0, kind: input, shape index: {}]   ;;  %s4635_s1 = inlined_call_operand.vmem [shape: f32[1,28], index: 1, kind: input, shape index: {}]   ;;  %s4636_s2 = inlined_call_operand.vmem [shape: f32[1,28], index: 2, kind: input, shape index: {}]   ;;  %s4637_s3 = inlined_call_operand.vmem [shape: bf16[28,32], index: 3, kind: input, shape index: {}]   ;;  %s4638_s4 = inlined_call_operand.vmem [shape: f32[1,32], index: 4, kind: input, shape index: {}]   ;;  %s4639_s5 = inlined_call_operand.vmem [shape: bf16[288,8], index: 5, kind: input, shape index: {}]   ;;  %s4640_s6 = inlined_call_operand.vmem [shape: f32[2,256,8], index: 6, kind: output, shape index: {}]  }
   0x1 LB: > { %s2862_s22 = sadd.s32 4294967295, %s3205_s21   ;;  %p2866_p0 = scmp.ge.s32.totalorder %s3205_s21, 1  ;;  %s3205_s21 = sphi %s3246_s21, %s16_s21  }
   0x2   : > { %p212_p1 = scmp.lt.s32.totalorder %s3205_s21, 3 }
   0x4   : > { %p213_p2 = pnand %p2866_p0, %p212_p1 }
   0x5   : > { %p242_p3 = scmp.lt.s32.totalorder (!%p213_p2), %s2862_s22, 1  ;;  %s3208_s11 = smov (!%p213_p2), 32  }
   0x6   : > { %216 = sbr.rel (%p213_p2) target bundleno = 933 (0x3a5), region = 44  ;;  %s3209_s12 = smov (!%p213_p2), 64  }
   0x7   : > { %s3210_s15 = smov (!%p213_p2), 96  }
   0xb   : > { %v3179_v0 = vld [vmem:[%s4637_s3 + $0x8] sm:$0x3f]   ;;  %vm482_vm0 = vcmask 1045504   ;;  %v3180_v1 = vld [vmem:[%s4637_s3] sm:$0xff]   ;;  %s4642_s22 = smov (!%p242_p3, %s2862_s22), 1  ;;  %vm433_vm1 = vcmask 228352  }
   0xc   : > { %3166 = vmatprep.subr.msk.bf16.mxu0 %vm482_vm0, %v3179_v0  ;;  %v484_v2 = vsel %vm482_vm0, %v3179_v0, 0  ;;  %v3265_v3 = vld [vmem:[%s4635_s1] ss:$0 sm:$0xff]  ;;  %s2928_s29 = sshll.u32 %s4642_s22, 8  ;;  %vm679_vm2 = vcmask 261120   ;;  %vm682_vm3 = vcmask 254976  }
   0xd   : > { %3079 = vmatpush3.bf16.msra.mxu0 %v484_v2  ;;  %v3271_v4 = vld [vmem:[%s4636_s2] ss:$0 sm:$0xff]  ;;  %s3278_s10 = scalar_lea.vmem %s4634_s0, %s2928_s29  ;;  %vm992_vm4 = vcmask 523520   ;;  %vm1185_vm5 = vcmask 785920   ;;  %vm1378_vm6 = vcmask 1048320   ;;  %s4473_s17 = scalar_lea.vmem %s4640_s6, %s2928_s29  ;;  %vm2774_vm7 = vcmask 64512  }
   0xe   : > { %3080 = vmatprep.subr.bf16.mxu0 %v3180_v1  ;;  %v253_v5 = vld [vmem:[%s3278_s10] sm:$0xff]  ;;  %v254_v6 = vld [vmem:[%s3278_s10 + $0x8] sm:$0xff]  ;;  %v255_v7 = vld [vmem:[%s3278_s10 + $0x10] sm:$0xff] }
   0xf   : > { %v292_v8 = vmul.f32 %v3265_v3, %v253_v5  ;;  %v293_v9 = vmul.f32 %v3265_v3, %v254_v6  ;;  %v256_v10 = vld [vmem:[%s3278_s10 + $0x18] sm:$0xff]  ;;  %v294_v11 = vmul.f32 %v3265_v3, %v255_v7  ;;  %v257_v12 = vld [vmem:[%s3278_s10 + $0x20] sm:$0xff]  ;;  %v258_v13 = vld [vmem:[%s3278_s10 + $0x28] sm:$0xff] }
  0x10   : > { %v295_v14 = vmul.f32 %v3265_v3, %v256_v10  ;;  %v296_v15 = vmul.f32 %v3265_v3, %v257_v12  ;;  %v297_v16 = vmul.f32 %v3265_v3, %v258_v13  ;;  %v259_v17 = vld [vmem:[%s3278_s10 + $0x30] sm:$0xff]  ;;  %v260_v18 = vld [vmem:[%s3278_s10 + $0x38] sm:$0xff]  ;;  %v261_v27 = vld [vmem:[%s3278_s10 + $0x40] sm:$0xff] }
  0x11   : > { %3081 = vmatpush3.bf16.msra.mxu0 %v3180_v1  ;;  %v331_v19 = vadd.f32 %v3271_v4, %v292_v8  ;;  %v332_v20 = vadd.f32 %v3271_v4, %v293_v9  ;;  %v333_v21 = vadd.f32 %v3271_v4, %v294_v11  ;;  %v298_v22 = vmul.f32 %v3265_v3, %v259_v17  ;;  %v262_v28 = vld [vmem:[%s3278_s10 + $0x48] sm:$0xff]  ;;  %v263_v37 = vld [vmem:[%s3278_s10 + $0x50] sm:$0xff]  ;;  %v264_v38 = vld [vmem:[%s3278_s10 + $0x58] sm:$0xff] }
  0x12   : > { %v334_v23 = vadd.f32 %v3271_v4, %v295_v14  ;;  %v335_v24 = vadd.f32 %v3271_v4, %v296_v15  ;;  %v336_v25 = vadd.f32 %v3271_v4, %v297_v16  ;;  %v299_v26 = vmul.f32 %v3265_v3, %v260_v18  ;;  %v265_v39 = vld [vmem:[%s3278_s10 + $0x60] sm:$0xff]  ;;  %v266_v43 = vld [vmem:[%s3278_s10 + $0x68] sm:$0xff]  ;;  %v267_v56 = vld [vmem:[%s3278_s10 + $0x70] sm:$0xff] }
  0x13   : > { %v363_v29 = vmax.f32 %v331_v19, 0.0  ;;  %v364_v30 = vmax.f32 %v332_v20, 0.0  ;;  %v365_v31 = vmax.f32 %v333_v21, 0.0  ;;  %v337_v32 = vadd.f32 %v3271_v4, %v298_v22  ;;  %v268_v57 = vld [vmem:[%s3278_s10 + $0x78] sm:$0xff]  ;;  %v269_v61 = vld [vmem:[%s3278_s10 + $0x80] sm:$0xff]  ;;  %v270_v1 = vld [vmem:[%s3278_s10 + $0x88] sm:$0xff] }
  0x14   : > { %v366_v33 = vmax.f32 %v334_v23, 0.0  ;;  %v367_v34 = vmax.f32 %v335_v24, 0.0  ;;  %v368_v35 = vmax.f32 %v336_v25, 0.0  ;;  %v338_v36 = vadd.f32 %v3271_v4, %v299_v26  ;;  %v271_v18 = vld [vmem:[%s3278_s10 + $0x90] sm:$0xff]  ;;  %v272_v19 = vld [vmem:[%s3278_s10 + $0x98] sm:$0xff] }
  0x15   : > { %v395_v40 = vpack.c.bf16 %v364_v30, %v363_v29  ;;  %v300_v41 = vmul.f32 %v3265_v3, %v261_v27  ;;  %v301_v42 = vmul.f32 %v3265_v3, %v262_v28  ;;  %v369_v46 = vmax.f32 %v337_v32, 0.0 }
  0x16   : > { %v396_v44 = vpack.c.bf16 %v366_v33, %v365_v31  ;;  %v397_v45 = vpack.c.bf16 %v368_v35, %v367_v34  ;;  %v370_v47 = vmax.f32 %v338_v36, 0.0  ;;  %v302_v50 = vmul.f32 %v3265_v3, %v263_v37 }
  0x17   : > { %3082 = vmatprep.mubr.msk.bf16.mxu0 %vm433_vm1, %v395_v40  ;;  %v339_v48 = vadd.f32 %v3271_v4, %v300_v41  ;;  %v340_v49 = vadd.f32 %v3271_v4, %v301_v42  ;;  %v303_v51 = vmul.f32 %v3265_v3, %v264_v38  ;;  %v304_v54 = vmul.f32 %v3265_v3, %v265_v39  ;;  %v273_v38 = vld [vmem:[%s3278_s10 + $0xa0] sm:$0xff]  ;;  %v274_v39 = vld [vmem:[%s3278_s10 + $0xa8] sm:$0xff]  ;;  %v275_v42 = vld [vmem:[%s3278_s10 + $0xb0] sm:$0xff] }
  0x18   : > { %3083 = vmatmul.mubr.msk.bf16.vlgmr.msra.gmra.mxu0 %vm433_vm1, %v396_v44  ;;  %v305_v55 = vmul.f32 %v3265_v3, %v266_v43  ;;  %v398_v58 = vpack.c.bf16 %v370_v47, %v369_v46  ;;  %v341_v59 = vadd.f32 %v3271_v4, %v302_v50  ;;  %v306_v6 = vmul.f32 %v3265_v3, %v267_v56  ;;  %v276_v43 = vld [vmem:[%s3278_s10 + $0xb8] sm:$0xff]  ;;  %v277_v56 = vld [vmem:[%s3278_s10 + $0xc0] sm:$0xff] }
  0x19   : > { %3086 = vmatprep.mubr.msk.bf16.mxu0 %vm433_vm1, %v397_v45  ;;  %v371_v52 = vmax.f32 %v339_v48, 0.0  ;;  %v372_v53 = vmax.f32 %v340_v49, 0.0  ;;  %v342_v60 = vadd.f32 %v3271_v4, %v303_v51  ;;  %v343_v63 = vadd.f32 %v3271_v4, %v304_v54 }
  0x1a   : > { %v344_v0 = vadd.f32 %v3271_v4, %v305_v55  ;;  %v373_v2 = vmax.f32 %v341_v59, 0.0  ;;  %v307_v7 = vmul.f32 %v3265_v3, %v268_v57  ;;  %v308_v10 = vmul.f32 %v3265_v3, %v269_v61  ;;  %v278_v57 = vld [vmem:[%s3278_s10 + $0xc8] sm:$0xff]  ;;  %v280_v61 = vld [vmem:[%s3278_s10 + $0xd8] sm:$0xff] }
  0x1b   : > { %v399_v62 = vpack.c.bf16 %v372_v53, %v371_v52  ;;  %v374_v5 = vmax.f32 %v342_v60, 0.0  ;;  %v375_v8 = vmax.f32 %v343_v63, 0.0  ;;  %v309_v11 = vmul.f32 %v3265_v3, %v270_v1  ;;  %v279_v60 = vld [vmem:[%s3278_s10 + $0xd0] sm:$0xff] }
  0x1c   : > { %v376_v9 = vmax.f32 %v344_v0, 0.0  ;;  %v345_v13 = vadd.f32 %v3271_v4, %v306_v6  ;;  %v346_v14 = vadd.f32 %v3271_v4, %v307_v7  ;;  %v347_v16 = vadd.f32 %v3271_v4, %v308_v10 }
  0x1d   : > { %v400_v12 = vpack.c.bf16 %v374_v5, %v373_v2  ;;  %v348_v17 = vadd.f32 %v3271_v4, %v309_v11  ;;  %v310_v22 = vmul.f32 %v3265_v3, %v271_v18  ;;  %v311_v23 = vmul.f32 %v3265_v3, %v272_v19 }
  0x1e   : > { %v401_v15 = vpack.c.bf16 %v376_v9, %v375_v8  ;;  %v377_v20 = vmax.f32 %v345_v13, 0.0  ;;  %v378_v21 = vmax.f32 %v346_v14, 0.0  ;;  %v379_v24 = vmax.f32 %v347_v16, 0.0  ;;  %v282_v13 = vld [vmem:[%s3278_s10 + $0xe8] sm:$0xff]  ;;  %v283_v16 = vld [vmem:[%s3278_s10 + $0xf0] sm:$0xff] }
  0x1f   : > { %v380_v25 = vmax.f32 %v348_v17, 0.0  ;;  %v349_v27 = vadd.f32 %v3271_v4, %v310_v22  ;;  %v350_v28 = vadd.f32 %v3271_v4, %v311_v23  ;;  %v3207_v33 = vmov 0.0   ;;  %v284_v17 = vld [vmem:[%s3278_s10 + $0xf8] sm:$0xff] }
  0x20   : > { %3087 = vmatmul.mubr.msk.bf16.gmra.mxu0 %vm433_vm1, %v398_v58  ;;  %v402_v26 = vpack.c.bf16 %v378_v21, %v377_v20  ;;  %687 = vst.msk [vmem:[#allocation2 + $0x30] sm:$0xff] %vm679_vm2, %v3207_v33  ;;  %688 = vst.msk [vmem:[#allocation2 + $0x38] sm:$0xff] %vm679_vm2, %v3207_v33  ;;  %v312_v40 = vmul.f32 %v3265_v3, %v273_v38  ;;  %v313_v41 = vmul.f32 %v3265_v3, %v274_v39 }
  0x21   : > { %3090 = vmatprep.mubr.msk.bf16.mxu0 %vm433_vm1, %v399_v62  ;;  %v403_v29 = vpack.c.bf16 %v380_v25, %v379_v24  ;;  %v381_v30 = vmax.f32 %v349_v27, 0.0  ;;  %v382_v31 = vmax.f32 %v350_v28, 0.0  ;;  %680 = vst.msk [vmem:[#allocation2] sm:$0xff] %vm679_vm2, %v3207_v33  ;;  %681 = vst.msk [vmem:[#allocation2 + $0x8] sm:$0xff] %vm679_vm2, %v3207_v33  ;;  %v314_v44 = vmul.f32 %v3265_v3, %v275_v42 }
  0x22   : > { %684 = vst.msk [vmem:[#allocation2 + $0x18] sm:$0xff] %vm679_vm2, %v3207_v33  ;;  %685 = vst.msk [vmem:[#allocation2 + $0x20] sm:$0xff] %vm679_vm2, %v3207_v33  ;;  %v315_v45 = vmul.f32 %v3265_v3, %v276_v43  ;;  %v351_v46 = vadd.f32 %v3271_v4, %v312_v40  ;;  %v352_v47 = vadd.f32 %v3271_v4, %v313_v41 }
  0x23   : > { %v404_v32 = vpack.c.bf16 %v382_v31, %v381_v30  ;;  %690 = vst.msk [vmem:[#allocation2 + $0x48] sm:$0xff] %vm679_vm2, %v3207_v33  ;;  %691 = vst.msk [vmem:[#allocation2 + $0x50] sm:$0xff] %vm679_vm2, %v3207_v33  ;;  %v353_v48 = vadd.f32 %v3271_v4, %v314_v44  ;;  %v316_v58 = vmul.f32 %v3265_v3, %v277_v56 }
  0x24   : > { %693 = vst.msk [vmem:[#allocation2 + $0x60] sm:$0xff] %vm679_vm2, %v3207_v33  ;;  %694 = vst.msk [vmem:[#allocation2 + $0x68] sm:$0xff] %vm679_vm2, %v3207_v33  ;;  %v354_v49 = vadd.f32 %v3271_v4, %v315_v45  ;;  %v383_v50 = vmax.f32 %v351_v46, 0.0  ;;  %v384_v51 = vmax.f32 %v352_v47, 0.0  ;;  %v317_v59 = vmul.f32 %v3265_v3, %v278_v57 }
  0x25   : > { %696 = vst.msk [vmem:[#allocation2 + $0x78] sm:$0xff] %vm679_vm2, %v3207_v33  ;;  %697 = vst.msk [vmem:[#allocation2 + $0x80] sm:$0xff] %vm679_vm2, %v3207_v33  ;;  %v385_v52 = vmax.f32 %v353_v48, 0.0  ;;  %v318_v62 = vmul.f32 %v3265_v3, %v279_v60  ;;  %v319_v63 = vmul.f32 %v3265_v3, %v280_v61  ;;  %v355_v0 = vadd.f32 %v3271_v4, %v316_v58 }
  0x26   : > { %699 = vst.msk [vmem:[#allocation2 + $0x90] sm:$0xff] %vm679_vm2, %v3207_v33  ;;  %700 = vst.msk [vmem:[#allocation2 + $0x98] sm:$0xff] %vm679_vm2, %v3207_v33  ;;  %v386_v53 = vmax.f32 %v354_v49, 0.0  ;;  %v405_v54 = vpack.c.bf16 %v384_v51, %v383_v50  ;;  %v356_v1 = vadd.f32 %v3271_v4, %v317_v59  ;;  %v322_v18 = vmul.f32 %v3265_v3, %v283_v16 }
  0x27   : > { %702 = vst.msk [vmem:[#allocation2 + $0xa8] sm:$0xff] %vm679_vm2, %v3207_v33  ;;  %703 = vst.msk [vmem:[#allocation2 + $0xb0] sm:$0xff] %vm679_vm2, %v3207_v33  ;;  %v357_v2 = vadd.f32 %v3271_v4, %v318_v62  ;;  %v358_v5 = vadd.f32 %v3271_v4, %v319_v63  ;;  %v387_v6 = vmax.f32 %v355_v0, 0.0  ;;  %v323_v19 = vmul.f32 %v3265_v3, %v284_v17  ;;  %v3183_v17 = vld [vmem:[%s4639_s5 + $0x70] sm:$0xff]  }
  0x28   : > { %3091 = vmatmul.mubr.msk.bf16.gmra.mxu0 %vm433_vm1, %v400_v12  ;;  %705 = vst.msk [vmem:[#allocation2 + $0xc0] sm:$0xff] %vm679_vm2, %v3207_v33  ;;  %706 = vst.msk [vmem:[#allocation2 + $0xc8] sm:$0xff] %vm679_vm2, %v3207_v33  ;;  %v832_v34 = vld [vmem:[#allocation2 + $0x1] sm:$0xff]  ;;  %v406_v55 = vpack.c.bf16 %v386_v53, %v385_v52  ;;  %v388_v7 = vmax.f32 %v356_v1, 0.0  ;;  %v361_v22 = vadd.f32 %v3271_v4, %v322_v18 }
  0x29   : > { %3094 = vmatprep.mubr.msk.bf16.mxu0 %vm433_vm1, %v401_v15  ;;  %708 = vst.msk [vmem:[#allocation2 + $0xd8] sm:$0xff] %vm679_vm2, %v3207_v33  ;;  %709 = vst.msk [vmem:[#allocation2 + $0xe0] sm:$0xff] %vm679_vm2, %v3207_v33  ;;  %896 = vrot.lane.b32.xlu0 %v832_v34, %s3208_s11  ;;  %v1025_v36 = vld [vmem:[#allocation2 + $0x2] sm:$0xff]  ;;  %v389_v8 = vmax.f32 %v357_v2, 0.0  ;;  %v390_v9 = vmax.f32 %v358_v5, 0.0  ;;  %v321_v15 = vmul.f32 %v3265_v3, %v282_v13 }
  0x2a   : > { %711 = vst.msk [vmem:[#allocation2 + $0xf0] sm:$0xff] %vm679_vm2, %v3207_v33  ;;  %712 = vst.msk [vmem:[#allocation2 + $0xf8] sm:$0xff] %vm679_vm2, %v3207_v33  ;;  %v407_v10 = vpack.c.bf16 %v388_v7, %v387_v6  ;;  %v281_v12 = vld [vmem:[%s3278_s10 + $0xe0] sm:$0xff]  ;;  %v362_v23 = vadd.f32 %v3271_v4, %v323_v19  ;;  %v769_v31 = vld [vmem:[#allocation2 + $0x8] sm:$0xff] }
  0x2b   : > { %714 = vst.msk [vmem:[#allocation2 + $0x108] sm:$0xff] %vm679_vm2, %v3207_v33  ;;  %715 = vst.msk [vmem:[#allocation2 + $0x110] sm:$0xff] %vm679_vm2, %v3207_v33  ;;  %v408_v11 = vpack.c.bf16 %v390_v9, %v389_v8  ;;  %v320_v14 = vmul.f32 %v3265_v3, %v281_v12  ;;  %v360_v21 = vadd.f32 %v3271_v4, %v321_v15  ;;  %v768_v3 = vld [vmem:[#allocation2] sm:$0xff]  ;;  %v3181_v7 = vld [vmem:[%s4639_s5 + $0x78] sm:$0xff]  }
  0x2c   : > { %717 = vst.msk [vmem:[#allocation2 + $0x120] sm:$0xff] %vm679_vm2, %v3207_v33  ;;  %718 = vst.msk [vmem:[#allocation2 + $0x128] sm:$0xff] %vm679_vm2, %v3207_v33  ;;  %v394_v27 = vmax.f32 %v362_v23, 0.0  ;;  %v3458_v34 = vld [vmem:[%s4638_s4] ss:$0 sm:$0xff]  ;;  %v3182_v8 = vld [vmem:[%s4639_s5 + $0x38] sm:$0xff]   ;;  %2948 = vmatprep.subr.bf16.mxu0 %v3181_v7  ;;  %3150 = vmatprep.subr.bf16.mxu1 %v3181_v7 }
  0x2d   : > { %720 = vst.msk [vmem:[#allocation2 + $0x138] sm:$0xff] %vm679_vm2, %v3207_v33  ;;  %721 = vst.msk [vmem:[#allocation2 + $0x140] sm:$0xff] %vm679_vm2, %v3207_v33  ;;  %1089 = vrot.lane.b32.xlu0 %v1025_v36, %s3209_s12  ;;  %v359_v20 = vadd.f32 %v3271_v4, %v320_v14  ;;  %v392_v25 = vmax.f32 %v360_v21, 0.0  ;;  %2949 = vmatpush3.bf16.msra.mxu0 %v3182_v8 }
  0x2e   : > { %723 = vst.msk [vmem:[#allocation2 + $0x150] sm:$0xff] %vm679_vm2, %v3207_v33  ;;  %724 = vst.msk [vmem:[#allocation2 + $0x158] sm:$0xff] %vm679_vm2, %v3207_v33  ;;  %3158 = vmatpush3.bf16.msra.mxu1 %v3182_v8  ;;  %2950 = vmatprep.subr.bf16.mxu0 %v3183_v17 }
  0x2f   : > { %726 = vst.msk [vmem:[#allocation2 + $0x168] sm:$0xff] %vm679_vm2, %v3207_v33  ;;  %727 = vst.msk [vmem:[#allocation2 + $0x170] sm:$0xff] %vm679_vm2, %v3207_v33  ;;  %v391_v24 = vmax.f32 %v359_v20, 0.0  ;;  %v3184_v20 = vld [vmem:[%s4639_s5 + $0x30] sm:$0xff]   ;;  %3151 = vmatprep.subr.bf16.mxu1 %v3183_v17 }
  0x30   : > { %3095 = vmatmul.mubr.msk.bf16.gmra.mxu0 %vm433_vm1, %v402_v26  ;;  %729 = vst.msk [vmem:[#allocation2 + $0x180] sm:$0xff] %vm679_vm2, %v3207_v33  ;;  %730 = vst.msk [vmem:[#allocation2 + $0x188] sm:$0xff] %vm679_vm2, %v3207_v33  ;;  %v393_v26 = vmax.f32 %v361_v22, 0.0 }
  0x31   : > { %3098 = vmatprep.mubr.msk.bf16.mxu0 %vm433_vm1, %v403_v29  ;;  %732 = vst.msk [vmem:[#allocation2 + $0x198] sm:$0xff] %vm679_vm2, %v3207_v33  ;;  %733 = vst.msk [vmem:[#allocation2 + $0x1a0] sm:$0xff] %vm679_vm2, %v3207_v33  ;;  %v409_v28 = vpack.c.bf16 %v392_v25, %v391_v24  ;;  %2951 = vmatpush3.bf16.msra.mxu0 %v3184_v20 }
  0x32   : > { %689 = vst.msk [vmem:[#allocation2 + $0x40] sm:$0x3] %vm682_vm3, %v3207_v33  ;;  %683 = vst.msk [vmem:[#allocation2 + $0x10] sm:$0x3] %vm682_vm3, %v3207_v33  ;;  %v410_v29 = vpack.c.bf16 %v394_v27, %v393_v26  ;;  %3159 = vmatpush3.bf16.msra.mxu1 %v3184_v20 }
  0x33   : > { %686 = vst.msk [vmem:[#allocation2 + $0x28] sm:$0x3] %vm682_vm3, %v3207_v33  ;;  %692 = vst.msk [vmem:[#allocation2 + $0x58] sm:$0x3] %vm682_vm3, %v3207_v33 }
  0x34   : > { %695 = vst.msk [vmem:[#allocation2 + $0x70] sm:$0x3] %vm682_vm3, %v3207_v33  ;;  %698 = vst.msk [vmem:[#allocation2 + $0x88] sm:$0x3] %vm682_vm3, %v3207_v33 }
  0x35   : > { %701 = vst.msk [vmem:[#allocation2 + $0xa0] sm:$0x3] %vm682_vm3, %v3207_v33  ;;  %704 = vst.msk [vmem:[#allocation2 + $0xb8] sm:$0x3] %vm682_vm3, %v3207_v33 }
  0x36   : > { %707 = vst.msk [vmem:[#allocation2 + $0xd0] sm:$0x3] %vm682_vm3, %v3207_v33  ;;  %710 = vst.msk [vmem:[#allocation2 + $0xe8] sm:$0x3] %vm682_vm3, %v3207_v33 }
  0x37   : > { %713 = vst.msk [vmem:[#allocation2 + $0x100] sm:$0x3] %vm682_vm3, %v3207_v33  ;;  %716 = vst.msk [vmem:[#allocation2 + $0x118] sm:$0x3] %vm682_vm3, %v3207_v33 }
  0x38   : > { %3099 = vmatmul.mubr.msk.bf16.gmra.mxu0 %vm433_vm1, %v404_v32  ;;  %719 = vst.msk [vmem:[#allocation2 + $0x130] sm:$0x3] %vm682_vm3, %v3207_v33  ;;  %722 = vst.msk [vmem:[#allocation2 + $0x148] sm:$0x3] %vm682_vm3, %v3207_v33 }
  0x39   : > { %725 = vst.msk [vmem:[#allocation2 + $0x160] sm:$0x3] %vm682_vm3, %v3207_v33  ;;  %728 = vst.msk [vmem:[#allocation2 + $0x178] sm:$0x3] %vm682_vm3, %v3207_v33  ;;  %v833_v35 = vld [vmem:[#allocation2 + $0x9] sm:$0xff]  ;;  %3102 = vmatprep.mubr.msk.bf16.mxu0 %vm433_vm1, %v405_v54 }
  0x3a   : > { %731 = vst.msk [vmem:[#allocation2 + $0x190] sm:$0x3] %vm682_vm3, %v3207_v33  ;;  %734 = vst.msk [vmem:[#allocation2 + $0x1a8] sm:$0x3] %vm682_vm3, %v3207_v33  ;;  %898 = vrot.lane.b32.xlu1 %v833_v35, %s3208_s11  ;;  %v1026_v37 = vld [vmem:[#allocation2 + $0xa] sm:$0xff] }
  0x3b   : > { %800 = vst.msk [vmem:[#allocation3] sm:$0xff] %vm679_vm2, %v768_v3  ;;  %801 = vst.msk [vmem:[#allocation3 + $0x18] sm:$0xff] %vm679_vm2, %v769_v31 }
  0x3e   : > { %1091 = vrot.lane.b32.xlu1 %v1026_v37, %s3209_s12 }
  0x40   : > { %3103 = vmatmul.mubr.msk.bf16.gmra.mxu0 %vm433_vm1, %v406_v55 }
  0x41   : > { %3106 = vmatprep.mubr.msk.bf16.mxu0 %vm433_vm1, %v407_v10 }
  0x48   : > { %3107 = vmatmul.mubr.msk.bf16.gmra.mxu0 %vm433_vm1, %v408_v11 }
  0x49   : > { %3110 = vmatprep.mubr.msk.bf16.mxu0 %vm433_vm1, %v409_v28 }
  0x50   : > { %3111 = vmatmul.mubr.msk.bf16.gmra.mxu0 %vm433_vm1, %v410_v29 }
  0x9b   : > { %v897_v30 = vpop.permute.xlu0 %896 }
  0x9c   : > { %993 = vst.msk [vmem:[#allocation3] sm:$0xff] %vm992_vm4, %v897_v30 }
  0x9f   : > { %v1090_v32 = vpop.permute.xlu0 %1089 }
  0xa0   : > { %1186 = vst.msk [vmem:[#allocation3] sm:$0xff] %vm1185_vm5, %v1090_v32  ;;  %v3186_v32 = vld [vmem:[%s4639_s5 + $0x28] sm:$0xff]  }
  0xac   : > { %v899_v4 = vpop.permute.xlu1 %898 }
  0xad   : > { %994 = vst.msk [vmem:[#allocation3 + $0x18] sm:$0xff] %vm992_vm4, %v899_v4  ;;  %v3185_v4 = vld [vmem:[%s4639_s5 + $0x68] sm:$0xff]  }
  0xae   : > { %2952 = vmatprep.subr.bf16.mxu0 %v3185_v4  ;;  %3152 = vmatprep.subr.bf16.mxu1 %v3185_v4  ;;  %v3726_v4 = vld [vmem:[%s4639_s5 + $0x88] sm:$0xff]  }
  0xaf   : > { %2953 = vmatpush3.bf16.msra.mxu0 %v3186_v32  ;;  %3160 = vmatpush3.bf16.msra.mxu1 %v3186_v32 }
  0xb0   : > { %v1092_v33 = vpop.permute.xlu1 %1091 }
  0xb1   : > { %1187 = vst.msk [vmem:[#allocation3 + $0x18] sm:$0xff] %vm1185_vm5, %v1092_v33 }
  0xd8   : > { %v3084_v35 = vpop.f32.mrf.mxu0 }
  0xd9   : > { %v529_v36 = vadd.f32 %v3084_v35, %v3458_v34 }
  0xda   : > { %v520_v37 = vpop.f32.mrf.mxu0 }
  0xdb   : > { %v649_v38 = vmax.f32 %v529_v36, 0.0  ;;  %v521_v39 = vadd.f32 %v3458_v34, %v520_v37 }
  0xdc   : > { %v3085_v40 = vpop.f32.mrf.mxu0 }
  0xdd   : > { %738 = vst.msk [vmem:[#allocation2 + $0x31] sm:$0xff] %vm679_vm2, %v649_v38  ;;  %v647_v41 = vmax.f32 %v521_v39, 0.0  ;;  %v532_v42 = vadd.f32 %v3085_v40, %v3458_v34 }
  0xde   : > { %v523_v43 = vpop.f32.mrf.mxu0 }
  0xdf   : > { %736 = vst.msk [vmem:[#allocation2 + $0x19] sm:$0xff] %vm679_vm2, %v647_v41  ;;  %v650_v44 = vmax.f32 %v532_v42, 0.0  ;;  %v524_v45 = vadd.f32 %v3458_v34, %v523_v43  ;;  %v3187_v43 = vld [vmem:[%s4639_s5 + $0x60] sm:$0xff]  }
  0xe0   : > { %v3088_v46 = vpop.f32.mrf.mxu0  ;;  %2954 = vmatprep.subr.bf16.mxu0 %v3187_v43  ;;  %3153 = vmatprep.subr.bf16.mxu1 %v3187_v43 }
  0xe1   : > { %739 = vst.msk [vmem:[#allocation2 + $0x39] sm:$0xff] %vm679_vm2, %v650_v44  ;;  %v648_v47 = vmax.f32 %v524_v45, 0.0  ;;  %v545_v48 = vadd.f32 %v3088_v46, %v3458_v34  ;;  %v3188_v46 = vld [vmem:[%s4639_s5 + $0x20] sm:$0xff]  }
  0xe2   : > { %v536_v49 = vpop.f32.mrf.mxu0  ;;  %2955 = vmatpush3.bf16.msra.mxu0 %v3188_v46  ;;  %3161 = vmatpush3.bf16.msra.mxu1 %v3188_v46 }
  0xe3   : > { %737 = vst.msk [vmem:[#allocation2 + $0x21] sm:$0xff] %vm679_vm2, %v648_v47  ;;  %v653_v50 = vmax.f32 %v545_v48, 0.0  ;;  %v537_v51 = vadd.f32 %v3458_v34, %v536_v49 }
  0xe4   : > { %v1220_v52 = vld [vmem:[#allocation2 + $0x30] sm:$0xff]  ;;  %v3089_v54 = vpop.f32.mrf.mxu0 }
  0xe5   : > { %v3471_v53 = vld [vmem:[#allocation2 + $0x31] sm:$0xff]  ;;  %1286 = vrot.lane.b32.xlu0 %v1220_v52, %s3210_s15  ;;  %742 = vst.msk [vmem:[#allocation2 + $0x61] sm:$0xff] %vm679_vm2, %v653_v50  ;;  %v651_v55 = vmax.f32 %v537_v51, 0.0  ;;  %v548_v56 = vadd.f32 %v3089_v54, %v3458_v34  ;;  %804 = vst.msk [vmem:[#allocation3 + $0x60] sm:$0xff] %vm679_vm2, %v1220_v52 }
  0xe6   : > { %1445 = vst.msk [vmem:[#allocation3 + $0x38] sm:$0xff] %vm679_vm2, %v3471_v53  ;;  %v834_v57 = vld [vmem:[#allocation2 + $0x19] sm:$0xff]  ;;  %v539_v59 = vpop.f32.mrf.mxu0 }
  0xe7   : > { %v3479_v58 = vld [vmem:[#allocation2 + $0x18] sm:$0xff]  ;;  %900 = vrot.lane.b32.xlu1 %v834_v57, %s3208_s11  ;;  %740 = vst.msk [vmem:[#allocation2 + $0x49] sm:$0xff] %vm679_vm2, %v651_v55  ;;  %v654_v60 = vmax.f32 %v548_v56, 0.0  ;;  %v540_v61 = vadd.f32 %v3458_v34, %v539_v59  ;;  %1443 = vst.msk [vmem:[#allocation3 + $0x8] sm:$0xff] %vm679_vm2, %v834_v57 }
  0xe8   : > { %802 = vst.msk [vmem:[#allocation3 + $0x30] sm:$0xff] %vm679_vm2, %v3479_v58  ;;  %v3487_v62 = vld [vmem:[#allocation2 + $0x32] sm:$0xff]  ;;  %v3489_v63 = vld [vmem:[#allocation2 + $0x3a] sm:$0xff]  ;;  %v3092_v1 = vpop.f32.mrf.mxu0 }
  0xe9   : > { %v3491_v0 = vld [vmem:[#allocation2 + $0x38] sm:$0xff]  ;;  %2084 = vst.msk [vmem:[#allocation3 + $0x10] sm:$0xff] %vm679_vm2, %v3487_v62  ;;  %2085 = vst.msk [vmem:[#allocation3 + $0x28] sm:$0xff] %vm679_vm2, %v3489_v63  ;;  %904 = vrot.lane.b32.xlu0 %v3471_v53, %s3208_s11  ;;  %v652_v5 = vmax.f32 %v540_v61, 0.0  ;;  %v561_v6 = vadd.f32 %v3092_v1, %v3458_v34  ;;  %v3192_v1 = vld [vmem:[%s4639_s5 + $0x10] sm:$0xff]  }
  0xea   : > { %v3499_v2 = vld [vmem:[#allocation2 + $0x39] sm:$0xff]  ;;  %743 = vst.msk [vmem:[#allocation2 + $0x69] sm:$0xff] %vm679_vm2, %v654_v60  ;;  %805 = vst.msk [vmem:[#allocation3 + $0x78] sm:$0xff] %vm679_vm2, %v3491_v0  ;;  %v3511_v9 = vld [vmem:[#allocation2 + $0x21] sm:$0xff]  ;;  %v552_v10 = vpop.f32.mrf.mxu0 }
  0xeb   : > { %1446 = vst.msk [vmem:[#allocation3 + $0x50] sm:$0xff] %vm679_vm2, %v3499_v2  ;;  %1288 = vrot.lane.b32.xlu1 %v3491_v0, %s3210_s15  ;;  %741 = vst.msk [vmem:[#allocation2 + $0x51] sm:$0xff] %vm679_vm2, %v652_v5  ;;  %v3518_v11 = vld [vmem:[#allocation2 + $0x20] sm:$0xff]  ;;  %v657_v12 = vmax.f32 %v561_v6, 0.0  ;;  %v553_v13 = vadd.f32 %v3458_v34, %v552_v10  ;;  %v3189_v57 = vld [vmem:[%s4639_s5 + $0x58] sm:$0xff]  }
  0xec   : > { %1444 = vst.msk [vmem:[#allocation3 + $0x20] sm:$0xff] %vm679_vm2, %v3511_v9  ;;  %v3523_v14 = vld [vmem:[#allocation2 + $0x60] sm:$0xff]  ;;  %v3093_v16 = vpop.f32.mrf.mxu0  ;;  %803 = vst.msk [vmem:[#allocation3 + $0x48] sm:$0xff] %vm679_vm2, %v3518_v11  ;;  %2956 = vmatprep.subr.bf16.mxu0 %v3189_v57  ;;  %3154 = vmatprep.subr.bf16.mxu1 %v3189_v57  ;;  %v3193_v6 = vld [vmem:[%s4639_s5 + $0x48] sm:$0xff]  }
  0xed   : > { %v3525_v15 = vld [vmem:[#allocation2 + $0x61] sm:$0xff]  ;;  %1732 = vrot.lane.b32.xlu0 %v1220_v52, %s3209_s12  ;;  %746 = vst.msk [vmem:[#allocation2 + $0x91] sm:$0xff] %vm679_vm2, %v657_v12  ;;  %v655_v18 = vmax.f32 %v553_v13, 0.0  ;;  %v564_v19 = vadd.f32 %v3093_v16, %v3458_v34  ;;  %808 = vst.msk [vmem:[#allocation3 + $0xc0] sm:$0xff] %vm679_vm2, %v3523_v14 }
  0xee   : > { %1449 = vst.msk [vmem:[#allocation3 + $0x98] sm:$0xff] %vm679_vm2, %v3525_v15  ;;  %v3542_v21 = vld [vmem:[#allocation2 + $0x48] sm:$0xff]  ;;  %v555_v23 = vpop.f32.mrf.mxu0 }
  0xef   : > { %v3544_v22 = vld [vmem:[#allocation2 + $0x49] sm:$0xff]  ;;  %906 = vrot.lane.b32.xlu1 %v3499_v2, %s3208_s11  ;;  %744 = vst.msk [vmem:[#allocation2 + $0x79] sm:$0xff] %vm679_vm2, %v655_v18  ;;  %v658_v24 = vmax.f32 %v564_v19, 0.0  ;;  %v556_v25 = vadd.f32 %v3458_v34, %v555_v23  ;;  %806 = vst.msk [vmem:[#allocation3 + $0x90] sm:$0xff] %vm679_vm2, %v3542_v21  ;;  %v1027_v19 = vld [vmem:[#allocation2 + $0x1a] sm:$0xff] }
  0xf0   : > { %1447 = vst.msk [vmem:[#allocation3 + $0x68] sm:$0xff] %vm679_vm2, %v3544_v22  ;;  %v3096_v29 = vpop.f32.mrf.mxu0  ;;  %v3194_v12 = vld [vmem:[%s4639_s5 + $0x8] sm:$0xff]   ;;  %v3196_v23 = vld [vmem:[%s4639_s5] sm:$0xff]  }
  0xf1   : > { %v3554_v26 = vld [vmem:[#allocation2 + $0x62] sm:$0xff]  ;;  %v3556_v27 = vld [vmem:[#allocation2 + $0x6a] sm:$0xff]  ;;  %1924 = vrot.lane.b32.xlu0 %v3471_v53, %s3210_s15  ;;  %747 = vst.msk [vmem:[#allocation2 + $0x99] sm:$0xff] %vm679_vm2, %v658_v24  ;;  %v656_v30 = vmax.f32 %v556_v25, 0.0  ;;  %v577_v31 = vadd.f32 %v3096_v29, %v3458_v34 }
  0xf2   : > { %v3558_v28 = vld [vmem:[#allocation2 + $0x68] sm:$0xff]  ;;  %2088 = vst.msk [vmem:[#allocation3 + $0x70] sm:$0xff] %vm679_vm2, %v3554_v26  ;;  %2089 = vst.msk [vmem:[#allocation3 + $0x88] sm:$0xff] %vm679_vm2, %v3556_v27  ;;  %v3580_v35 = vld [vmem:[#allocation2 + $0x52] sm:$0xff]  ;;  %v568_v37 = vpop.f32.mrf.mxu0 }
  0xf3   : > { %v3566_v3 = vld [vmem:[#allocation2 + $0x69] sm:$0xff]  ;;  %809 = vst.msk [vmem:[#allocation3 + $0xd8] sm:$0xff] %vm679_vm2, %v3558_v28  ;;  %1099 = vrot.lane.b32.xlu1 %v3489_v63, %s3209_s12  ;;  %2087 = vst.msk [vmem:[#allocation3 + $0x58] sm:$0xff] %vm679_vm2, %v3580_v35  ;;  %v3592_v38 = vld [vmem:[#allocation2 + $0x51] sm:$0xff]  ;;  %v661_v39 = vmax.f32 %v577_v31, 0.0  ;;  %v569_v40 = vadd.f32 %v3458_v34, %v568_v37 }
  0xf4   : > { %v3578_v33 = vld [vmem:[#allocation2 + $0x4a] sm:$0xff]  ;;  %1450 = vst.msk [vmem:[#allocation3 + $0xb0] sm:$0xff] %vm679_vm2, %v3566_v3  ;;  %745 = vst.msk [vmem:[#allocation2 + $0x81] sm:$0xff] %vm679_vm2, %v656_v30  ;;  %v3097_v42 = vpop.f32.mrf.mxu0  ;;  %v1028_v13 = vld [vmem:[#allocation2 + $0x22] sm:$0xff] }
  0xf5   : > { %v3582_v36 = vld [vmem:[#allocation2 + $0x50] sm:$0xff]  ;;  %2086 = vst.msk [vmem:[#allocation3 + $0x40] sm:$0xff] %vm679_vm2, %v3578_v33  ;;  %1448 = vst.msk [vmem:[#allocation3 + $0x80] sm:$0xff] %vm679_vm2, %v3592_v38  ;;  %1282 = vrot.lane.b32.xlu0 %v3479_v58, %s3210_s15  ;;  %v659_v44 = vmax.f32 %v569_v40, 0.0  ;;  %v580_v45 = vadd.f32 %v3097_v42, %v3458_v34  ;;  %v3190_v58 = vld [vmem:[%s4639_s5 + $0x18] sm:$0xff]  }
  0xf6   : > { %807 = vst.msk [vmem:[#allocation3 + $0xa8] sm:$0xff] %vm679_vm2, %v3582_v36  ;;  %v3598_v41 = vld [vmem:[#allocation2 + $0x90] sm:$0xff]  ;;  %750 = vst.msk [vmem:[#allocation2 + $0xc1] sm:$0xff] %vm679_vm2, %v661_v39  ;;  %v3614_v48 = vld [vmem:[#allocation2 + $0x78] sm:$0xff]  ;;  %v571_v49 = vpop.f32.mrf.mxu0  ;;  %2957 = vmatpush3.bf16.msra.mxu0 %v3190_v58  ;;  %3162 = vmatpush3.bf16.msra.mxu1 %v3190_v58 }
  0xf7   : > { %812 = vst.msk [vmem:[#allocation3 + $0x120] sm:$0xff] %vm679_vm2, %v3598_v41  ;;  %v1421_v47 = vld [vmem:[#allocation2 + $0x91] sm:$0xff]  ;;  %v1419_v50 = vld [vmem:[#allocation2 + $0x79] sm:$0xff]  ;;  %1734 = vrot.lane.b32.xlu1 %v3491_v0, %s3209_s12  ;;  %748 = vst.msk [vmem:[#allocation2 + $0xa9] sm:$0xff] %vm679_vm2, %v659_v44  ;;  %v662_v51 = vmax.f32 %v580_v45, 0.0  ;;  %v572_v52 = vadd.f32 %v3458_v34, %v571_v49 }
  0xf8   : > { %1453 = vst.msk [vmem:[#allocation3 + $0xf8] sm:$0xff] %vm679_vm2, %v1421_v47  ;;  %810 = vst.msk [vmem:[#allocation3 + $0xf0] sm:$0xff] %vm679_vm2, %v3614_v48  ;;  %v3624_v53 = vld [vmem:[#allocation2 + $0x92] sm:$0xff]  ;;  %v3626_v54 = vld [vmem:[#allocation2 + $0x9a] sm:$0xff]  ;;  %v3100_v30 = vpop.f32.mrf.mxu0 }
  0xf9   : > { %1451 = vst.msk [vmem:[#allocation3 + $0xc8] sm:$0xff] %vm679_vm2, %v1419_v50  ;;  %1543 = vrot.lane.b32.xlu0 %v3487_v62, %s3208_s11  ;;  %2092 = vst.msk [vmem:[#allocation3 + $0xd0] sm:$0xff] %vm679_vm2, %v3624_v53  ;;  %v3634_v55 = vld [vmem:[#allocation2 + $0x99] sm:$0xff]  ;;  %v660_v56 = vmax.f32 %v572_v52, 0.0  ;;  %v3191_v0 = vld [vmem:[%s4639_s5 + $0x50] sm:$0xff]   ;;  %v593_v31 = vadd.f32 %v3100_v30, %v3458_v34 }
  0xfa   : > { %2093 = vst.msk [vmem:[#allocation3 + $0xe8] sm:$0xff] %vm679_vm2, %v3626_v54  ;;  %751 = vst.msk [vmem:[#allocation2 + $0xc9] sm:$0xff] %vm679_vm2, %v662_v51  ;;  %2958 = vmatprep.subr.bf16.mxu0 %v3191_v0  ;;  %3155 = vmatprep.subr.bf16.mxu1 %v3191_v0  ;;  %v781_v5 = vld [vmem:[#allocation2 + $0x98] sm:$0xff]  ;;  %v584_v37 = vpop.f32.mrf.mxu0 }
  0xfb   : > { %v3643_v59 = vld [vmem:[#allocation2 + $0x7a] sm:$0xff]  ;;  %v3645_v60 = vld [vmem:[#allocation2 + $0x82] sm:$0xff]  ;;  %1454 = vst.msk [vmem:[#allocation3 + $0x110] sm:$0xff] %vm679_vm2, %v3634_v55  ;;  %1926 = vrot.lane.b32.xlu1 %v3499_v2, %s3210_s15  ;;  %749 = vst.msk [vmem:[#allocation2 + $0xb1] sm:$0xff] %vm679_vm2, %v660_v56  ;;  %2959 = vmatpush3.bf16.msra.mxu0 %v3192_v1  ;;  %v665_v32 = vmax.f32 %v593_v31, 0.0  ;;  %v585_v39 = vadd.f32 %v3458_v34, %v584_v37 }
  0xfc   : > { %2090 = vst.msk [vmem:[#allocation3 + $0xa0] sm:$0xff] %vm679_vm2, %v3643_v59  ;;  %2091 = vst.msk [vmem:[#allocation3 + $0xb8] sm:$0xff] %vm679_vm2, %v3645_v60  ;;  %v3655_v61 = vld [vmem:[#allocation2 + $0x81] sm:$0xff]  ;;  %2960 = vmatprep.subr.bf16.mxu0 %v3193_v6  ;;  %3163 = vmatpush3.bf16.msra.mxu1 %v3192_v1  ;;  %v3101_v40 = vpop.f32.mrf.mxu0  ;;  %v1866_v30 = vld [vmem:[#allocation2 + $0x79] sm:$0xff] }
  0xfd   : > { %1452 = vst.msk [vmem:[#allocation3 + $0xe0] sm:$0xff] %vm679_vm2, %v3655_v61  ;;  %1545 = vrot.lane.b32.xlu0 %v3489_v63, %s3208_s11  ;;  %813 = vst.msk [vmem:[#allocation3 + $0x138] sm:$0xff] %vm679_vm2, %v781_v5  ;;  %v779_v63 = vld [vmem:[#allocation2 + $0x80] sm:$0xff]  ;;  %3156 = vmatprep.subr.bf16.mxu1 %v3193_v6  ;;  %v663_v42 = vmax.f32 %v585_v39, 0.0  ;;  %v596_v43 = vadd.f32 %v3101_v40, %v3458_v34 }
  0xfe   : > { %v3668_v2 = vld [vmem:[#allocation2 + $0xa8] sm:$0xff]  ;;  %v784_v7 = vld [vmem:[#allocation2 + $0xc0] sm:$0xff]  ;;  %811 = vst.msk [vmem:[#allocation3 + $0x108] sm:$0xff] %vm679_vm2, %v779_v63  ;;  %754 = vst.msk [vmem:[#allocation2 + $0xf1] sm:$0xff] %vm679_vm2, %v665_v32  ;;  %v587_v44 = vpop.f32.mrf.mxu0 }
  0xff   : > { %902 = vrot.lane.b32.xlu1 %v3511_v9, %s3208_s11  ;;  %814 = vst.msk [vmem:[#allocation3 + $0x150] sm:$0xff] %vm679_vm2, %v3668_v2  ;;  %816 = vst.msk [vmem:[#allocation3 + $0x180] sm:$0xff] %vm679_vm2, %v784_v7  ;;  %2961 = vmatpush3.bf16.msra.mxu0 %v3194_v12  ;;  %v1425_v24 = vld [vmem:[#allocation2 + $0xc1] sm:$0xff]  ;;  %v1423_v25 = vld [vmem:[#allocation2 + $0xa9] sm:$0xff]  ;;  %v666_v45 = vmax.f32 %v596_v43, 0.0 }
 0x100   : > { %3164 = vmatpush3.bf16.msra.mxu1 %v3194_v12  ;;  %1457 = vst.msk [vmem:[#allocation3 + $0x158] sm:$0xff] %vm679_vm2, %v1425_v24  ;;  %1455 = vst.msk [vmem:[#allocation3 + $0x128] sm:$0xff] %vm679_vm2, %v1423_v25  ;;  %v1677_v12 = vld [vmem:[#allocation2 + $0x98] sm:$0xff]  ;;  %v1675_v43 = vld [vmem:[#allocation2 + $0x80] sm:$0xff] }
 0x101   : > { %v3678_v8 = vld [vmem:[#allocation2 + $0xc2] sm:$0xff]  ;;  %v3680_v10 = vld [vmem:[#allocation2 + $0xca] sm:$0xff]  ;;  %1097 = vrot.lane.b32.xlu0 %v3487_v62, %s3209_s12  ;;  %752 = vst.msk [vmem:[#allocation2 + $0xd9] sm:$0xff] %vm679_vm2, %v663_v42  ;;  %755 = vst.msk [vmem:[#allocation2 + $0xf9] sm:$0xff] %vm679_vm2, %v666_v45 }
 0x102   : > { %2096 = vst.msk [vmem:[#allocation3 + $0x130] sm:$0xff] %vm679_vm2, %v3678_v8  ;;  %2097 = vst.msk [vmem:[#allocation3 + $0x148] sm:$0xff] %vm679_vm2, %v3680_v10  ;;  %v3690_v9 = vld [vmem:[#allocation2 + $0xc9] sm:$0xff]  ;;  %v3697_v17 = vld [vmem:[#allocation2 + $0xb2] sm:$0xff] }
 0x103   : > { %v3695_v16 = vld [vmem:[#allocation2 + $0xaa] sm:$0xff]  ;;  %1458 = vst.msk [vmem:[#allocation3 + $0x170] sm:$0xff] %vm679_vm2, %v3690_v9  ;;  %1095 = vrot.lane.b32.xlu1 %v1028_v13, %s3209_s12  ;;  %2095 = vst.msk [vmem:[#allocation3 + $0x118] sm:$0xff] %vm679_vm2, %v3697_v17  ;;  %v3195_v62 = vld [vmem:[%s4639_s5 + $0x40] sm:$0xff]  }
 0x104   : > { %2094 = vst.msk [vmem:[#allocation3 + $0x100] sm:$0xff] %vm679_vm2, %v3695_v16  ;;  %v3709_v18 = vld [vmem:[#allocation2 + $0xb1] sm:$0xff]  ;;  %v785_v20 = vld [vmem:[#allocation2 + $0xc8] sm:$0xff]  ;;  %2962 = vmatprep.subr.bf16.mxu0 %v3195_v62  ;;  %3157 = vmatprep.subr.bf16.mxu1 %v3195_v62 }
 0x105   : > { %1456 = vst.msk [vmem:[#allocation3 + $0x140] sm:$0xff] %vm679_vm2, %v3709_v18  ;;  %1093 = vrot.lane.b32.xlu0 %v1027_v19, %s3209_s12  ;;  %817 = vst.msk [vmem:[#allocation3 + $0x198] sm:$0xff] %vm679_vm2, %v785_v20  ;;  %v783_v29 = vld [vmem:[#allocation2 + $0xb0] sm:$0xff]  ;;  %2963 = vmatpush3.bf16.msra.mxu0 %v3196_v23 }
 0x106   : > { %815 = vst.msk [vmem:[#allocation3 + $0x168] sm:$0xff] %vm679_vm2, %v783_v29  ;;  %3114 = vmatprep.subr.bf16.mxu0 %v3726_v4  ;;  %3165 = vmatpush3.bf16.msra.mxu1 %v3196_v23  ;;  %v3777_v52 = vld [vmem:[#allocation2 + $0xf1] sm:$0xff] }
 0x107   : > { %1541 = vrot.lane.b32.xlu1 %v1028_v13, %s3208_s11  ;;  %1461 = vst.msk [vmem:[#allocation3 + $0x1b8] sm:$0xff] %vm679_vm2, %v3777_v52 }
 0x108   : > { %v3751_v47 = vld [vmem:[#allocation2 + $0xf2] sm:$0xff]  ;;  %v3753_v49 = vld [vmem:[#allocation2 + $0xfa] sm:$0xff] }
 0x109   : > { %1539 = vrot.lane.b32.xlu0 %v1027_v19, %s3208_s11  ;;  %2100 = vst.msk [vmem:[#allocation3 + $0x190] sm:$0xff] %vm679_vm2, %v3751_v47  ;;  %2101 = vst.msk [vmem:[#allocation3 + $0x1a8] sm:$0xff] %vm679_vm2, %v3753_v49  ;;  %v3779_v56 = vld [vmem:[#allocation2 + $0xf9] sm:$0xff] }
 0x10a   : > { %v3785_v57 = vld [vmem:[#allocation2 + $0xd9] sm:$0xff]  ;;  %1462 = vst.msk [vmem:[#allocation3 + $0x1d0] sm:$0xff] %vm679_vm2, %v3779_v56 }
 0x10b   : > { %1284 = vrot.lane.b32.xlu1 %v3518_v11, %s3210_s15  ;;  %v588_v11 = vadd.f32 %v3458_v34, %v587_v44  ;;  %1459 = vst.msk [vmem:[#allocation3 + $0x188] sm:$0xff] %vm679_vm2, %v3785_v57 }
 0x10d   : > { %1740 = vrot.lane.b32.xlu0 %v3523_v14, %s3209_s12  ;;  %v664_v46 = vmax.f32 %v588_v11, 0.0 }
 0x10f   : > { %1742 = vrot.lane.b32.xlu1 %v3558_v28, %s3209_s12  ;;  %753 = vst.msk [vmem:[#allocation2 + $0xe1] sm:$0xff] %vm679_vm2, %v664_v46 }
 0x111   : > { %1932 = vrot.lane.b32.xlu0 %v3525_v15, %s3210_s15 }
 0x113   : > { %1934 = vrot.lane.b32.xlu1 %v3566_v3, %s3210_s15 }
 0x115   : > { %1294 = vrot.lane.b32.xlu0 %v3523_v14, %s3210_s15  ;;  %v3771_v14 = vld [vmem:[#allocation2 + $0xf0] sm:$0xff] }
 0x116   : > { %v3761_v50 = vld [vmem:[#allocation2 + $0xda] sm:$0xff]  ;;  %v3763_v51 = vld [vmem:[#allocation2 + $0xe2] sm:$0xff]  ;;  %820 = vst.msk [vmem:[#allocation3 + $0x1e0] sm:$0xff] %vm679_vm2, %v3771_v14 }
 0x117   : > { %1553 = vrot.lane.b32.xlu1 %v3556_v27, %s3208_s11  ;;  %2098 = vst.msk [vmem:[#allocation3 + $0x160] sm:$0xff] %vm679_vm2, %v3761_v50  ;;  %2099 = vst.msk [vmem:[#allocation3 + $0x178] sm:$0xff] %vm679_vm2, %v3763_v51  ;;  %v3787_v58 = vld [vmem:[#allocation2 + $0xe0] sm:$0xff] }
 0x118   : > { %v3797_v0 = vld [vmem:[#allocation2 + $0xe1] sm:$0xff]  ;;  %819 = vst.msk [vmem:[#allocation3 + $0x1c8] sm:$0xff] %vm679_vm2, %v3787_v58 }
 0x119   : > { %912 = vrot.lane.b32.xlu0 %v3525_v15, %s3208_s11  ;;  %v3775_v15 = vld [vmem:[#allocation2 + $0xf8] sm:$0xff]  ;;  %1460 = vst.msk [vmem:[#allocation3 + $0x1a0] sm:$0xff] %vm679_vm2, %v3797_v0 }
 0x11a   : > { %821 = vst.msk [vmem:[#allocation3 + $0x1f8] sm:$0xff] %vm679_vm2, %v3775_v15 }
 0x11b   : > { %1296 = vrot.lane.b32.xlu1 %v3558_v28, %s3210_s15  ;;  %v3783_v28 = vld [vmem:[#allocation2 + $0xd8] sm:$0xff] }
 0x11c   : > { %818 = vst.msk [vmem:[#allocation3 + $0x1b0] sm:$0xff] %vm679_vm2, %v3783_v28 }
 0x11d   : > { %1736 = vrot.lane.b32.xlu0 %v3542_v21, %s3209_s12 }
 0x11f   : > { %914 = vrot.lane.b32.xlu1 %v3566_v3, %s3208_s11 }
 0x121   : > { %1928 = vrot.lane.b32.xlu0 %v3544_v22, %s3210_s15 }
 0x123   : > { %1107 = vrot.lane.b32.xlu1 %v3556_v27, %s3209_s12 }
 0x125   : > { %1290 = vrot.lane.b32.xlu0 %v3542_v21, %s3210_s15  ;;  %v3104_v21 = vpop.f32.mrf.mxu0 }
 0x126   : > { %v609_v27 = vadd.f32 %v3104_v21, %v3458_v34 }
 0x127   : > { %1738 = vrot.lane.b32.xlu1 %v3582_v36, %s3209_s12 }
 0x128   : > { %v669_v3 = vmax.f32 %v609_v27, 0.0 }
 0x129   : > { %908 = vrot.lane.b32.xlu0 %v3544_v22, %s3208_s11  ;;  %v600_v22 = vpop.f32.mrf.mxu0 }
 0x12a   : > { %v601_v1 = vadd.f32 %v3458_v34, %v600_v22  ;;  %758 = vst.msk [vmem:[#allocation2 + $0x121] sm:$0xff] %vm679_vm2, %v669_v3 }
 0x12b   : > { %1930 = vrot.lane.b32.xlu1 %v3592_v38, %s3210_s15  ;;  %v3105_v5 = vpop.f32.mrf.mxu0 }
 0x12c   : > { %v612_v6 = vadd.f32 %v3105_v5, %v3458_v34 }
 0x12d   : > { %1551 = vrot.lane.b32.xlu0 %v3554_v26, %s3208_s11 }
 0x12e   : > { %v670_v63 = vmax.f32 %v612_v6, 0.0 }
 0x12f   : > { %1549 = vrot.lane.b32.xlu1 %v3580_v35, %s3208_s11 }
 0x130   : > { %759 = vst.msk [vmem:[#allocation2 + $0x129] sm:$0xff] %vm679_vm2, %v670_v63 }
 0x131   : > { %1105 = vrot.lane.b32.xlu0 %v3554_v26, %s3209_s12  ;;  %v667_v26 = vmax.f32 %v601_v1, 0.0  ;;  %v792_v31 = vld [vmem:[#allocation2 + $0x120] sm:$0xff] }
 0x132   : > { %824 = vst.msk [vmem:[#allocation3 + $0x240] sm:$0xff] %vm679_vm2, %v792_v31 }
 0x133   : > { %1292 = vrot.lane.b32.xlu1 %v3582_v36, %s3210_s15  ;;  %v603_v36 = vpop.f32.mrf.mxu0  ;;  %756 = vst.msk [vmem:[#allocation2 + $0x109] sm:$0xff] %vm679_vm2, %v667_v26 }
 0x134   : > { %v604_v7 = vadd.f32 %v3458_v34, %v603_v36 }
 0x135   : > { %1547 = vrot.lane.b32.xlu0 %v3578_v33, %s3208_s11 }
 0x137   : > { %910 = vrot.lane.b32.xlu1 %v3592_v38, %s3208_s11  ;;  %v668_v38 = vmax.f32 %v604_v7, 0.0  ;;  %v3849_v13 = vld [vmem:[#allocation2 + $0x122] sm:$0xff] }
 0x138   : > { %2104 = vst.msk [vmem:[#allocation3 + $0x1f0] sm:$0xff] %vm679_vm2, %v3849_v13  ;;  %v3875_v20 = vld [vmem:[#allocation2 + $0x129] sm:$0xff] }
 0x139   : > { %1101 = vrot.lane.b32.xlu0 %v3578_v33, %s3209_s12  ;;  %757 = vst.msk [vmem:[#allocation2 + $0x111] sm:$0xff] %vm679_vm2, %v668_v38  ;;  %v1868_v33 = vld [vmem:[#allocation2 + $0x91] sm:$0xff]  ;;  %1466 = vst.msk [vmem:[#allocation3 + $0x230] sm:$0xff] %vm679_vm2, %v3875_v20  ;;  %v793_v32 = vld [vmem:[#allocation2 + $0x128] sm:$0xff] }
 0x13a   : > { %v3877_v23 = vld [vmem:[#allocation2 + $0x108] sm:$0xff]  ;;  %825 = vst.msk [vmem:[#allocation3 + $0x258] sm:$0xff] %vm679_vm2, %v793_v32 }
 0x13b   : > { %1103 = vrot.lane.b32.xlu1 %v3580_v35, %s3209_s12  ;;  %v3851_v35 = vld [vmem:[#allocation2 + $0x12a] sm:$0xff]  ;;  %822 = vst.msk [vmem:[#allocation3 + $0x210] sm:$0xff] %vm679_vm2, %v3877_v23 }
 0x13c   : > { %2105 = vst.msk [vmem:[#allocation3 + $0x208] sm:$0xff] %vm679_vm2, %v3851_v35  ;;  %v3879_v24 = vld [vmem:[#allocation2 + $0x109] sm:$0xff] }
 0x13d   : > { %1748 = vrot.lane.b32.xlu0 %v3598_v41, %s3209_s12  ;;  %1463 = vst.msk [vmem:[#allocation3 + $0x1e8] sm:$0xff] %vm679_vm2, %v3879_v24 }
 0x13f   : > { %1750 = vrot.lane.b32.xlu1 %v1677_v12, %s3209_s12 }
 0x140   : > { %v3859_v62 = vld [vmem:[#allocation2 + $0x10a] sm:$0xff]  ;;  %v3861_v19 = vld [vmem:[#allocation2 + $0x112] sm:$0xff] }
 0x141   : > { %1940 = vrot.lane.b32.xlu0 %v1868_v33, %s3210_s15  ;;  %2102 = vst.msk [vmem:[#allocation3 + $0x1c0] sm:$0xff] %vm679_vm2, %v3859_v62  ;;  %2103 = vst.msk [vmem:[#allocation3 + $0x1d8] sm:$0xff] %vm679_vm2, %v3861_v19  ;;  %v3881_v25 = vld [vmem:[#allocation2 + $0x110] sm:$0xff] }
 0x142   : > { %v3889_v29 = vld [vmem:[#allocation2 + $0x111] sm:$0xff]  ;;  %823 = vst.msk [vmem:[#allocation3 + $0x228] sm:$0xff] %vm679_vm2, %v3881_v25 }
 0x143   : > { %1942 = vrot.lane.b32.xlu1 %v3634_v55, %s3210_s15  ;;  %1464 = vst.msk [vmem:[#allocation3 + $0x200] sm:$0xff] %vm679_vm2, %v3889_v29 }
 0x145   : > { %1302 = vrot.lane.b32.xlu0 %v3598_v41, %s3210_s15  ;;  %v3873_v41 = vld [vmem:[#allocation2 + $0x121] sm:$0xff] }
 0x146   : > { %1465 = vst.msk [vmem:[#allocation3 + $0x218] sm:$0xff] %vm679_vm2, %v3873_v41 }
 0x147   : > { %1561 = vrot.lane.b32.xlu1 %v3626_v54, %s3208_s11 }
 0x149   : > { %920 = vrot.lane.b32.xlu0 %v1868_v33, %s3208_s11 }
 0x14b   : > { %1304 = vrot.lane.b32.xlu1 %v1677_v12, %s3210_s15 }
 0x14d   : > { %1744 = vrot.lane.b32.xlu0 %v3614_v48, %s3209_s12 }
 0x14f   : > { %922 = vrot.lane.b32.xlu1 %v3634_v55, %s3208_s11  ;;  %v3108_v55 = vpop.f32.mrf.mxu0 }
 0x150   : > { %v625_v37 = vadd.f32 %v3108_v55, %v3458_v34 }
 0x151   : > { %1936 = vrot.lane.b32.xlu0 %v1866_v30, %s3210_s15  ;;  %v616_v40 = vpop.f32.mrf.mxu0 }
 0x152   : > { %v673_v39 = vmax.f32 %v625_v37, 0.0  ;;  %v617_v42 = vadd.f32 %v3458_v34, %v616_v40 }
 0x153   : > { %1115 = vrot.lane.b32.xlu1 %v3626_v54, %s3209_s12  ;;  %v3109_v44 = vpop.f32.mrf.mxu0 }
 0x154   : > { %762 = vst.msk [vmem:[#allocation2 + $0x151] sm:$0xff] %vm679_vm2, %v673_v39  ;;  %v671_v11 = vmax.f32 %v617_v42, 0.0  ;;  %v628_v46 = vadd.f32 %v3109_v44, %v3458_v34  ;;  %v1681_v42 = vld [vmem:[#allocation2 + $0xc8] sm:$0xff] }
 0x155   : > { %1298 = vrot.lane.b32.xlu0 %v3614_v48, %s3210_s15  ;;  %v619_v21 = vpop.f32.mrf.mxu0 }
 0x156   : > { %760 = vst.msk [vmem:[#allocation2 + $0x139] sm:$0xff] %vm679_vm2, %v671_v11  ;;  %v674_v48 = vmax.f32 %v628_v46, 0.0  ;;  %v620_v27 = vadd.f32 %v3458_v34, %v619_v21  ;;  %v1872_v11 = vld [vmem:[#allocation2 + $0xc1] sm:$0xff] }
 0x157   : > { %v3909_v45 = vpop.permute.xlu0 %1286  ;;  %1746 = vrot.lane.b32.xlu1 %v1675_v43, %s3209_s12 }
 0x158   : > { %763 = vst.msk [vmem:[#allocation2 + $0x159] sm:$0xff] %vm679_vm2, %v674_v48  ;;  %v672_v3 = vmax.f32 %v620_v27, 0.0 }
 0x159   : > { %916 = vrot.lane.b32.xlu0 %v1866_v30, %s3208_s11  ;;  %v901_v54 = vpop.permute.xlu1 %900  ;;  %v1680_v30 = vld [vmem:[#allocation2 + $0xc0] sm:$0xff] }
 0x15a   : > { %995 = vst.msk [vmem:[#allocation3 + $0x30] sm:$0xff] %vm992_vm4, %v901_v54 }
 0x15b   : > { %v905_v22 = vpop.permute.xlu0 %904  ;;  %1938 = vrot.lane.b32.xlu1 %v3655_v61, %s3210_s15  ;;  %761 = vst.msk [vmem:[#allocation2 + $0x141] sm:$0xff] %vm679_vm2, %v672_v3  ;;  %v3969_v39 = vld [vmem:[#allocation2 + $0x150] sm:$0xff] }
 0x15c   : > { %997 = vst.msk [vmem:[#allocation3 + $0x60] sm:$0xff] %vm992_vm4, %v905_v22 }
 0x15d   : > { %1559 = vrot.lane.b32.xlu0 %v3624_v53, %s3208_s11  ;;  %v1289_v1 = vpop.permute.xlu1 %1288  ;;  %v3960_v32 = vld [vmem:[#allocation2 + $0x138] sm:$0xff]  ;;  %828 = vst.msk [vmem:[#allocation3 + $0x2a0] sm:$0xff] %vm679_vm2, %v3969_v39 }
 0x15e   : > { %v3964_v37 = vld [vmem:[#allocation2 + $0x139] sm:$0xff]  ;;  %826 = vst.msk [vmem:[#allocation3 + $0x270] sm:$0xff] %vm679_vm2, %v3960_v32 }
 0x15f   : > { %v3924_v5 = vpop.permute.xlu0 %1732  ;;  %1557 = vrot.lane.b32.xlu1 %v3645_v60, %s3208_s11  ;;  %v3931_v6 = vld [vmem:[#allocation2 + $0x152] sm:$0xff]  ;;  %v3933_v36 = vld [vmem:[#allocation2 + $0x15a] sm:$0xff]  ;;  %1467 = vst.msk [vmem:[#allocation3 + $0x248] sm:$0xff] %vm679_vm2, %v3964_v37 }
 0x160   : > { %2108 = vst.msk [vmem:[#allocation3 + $0x250] sm:$0xff] %vm679_vm2, %v3931_v6  ;;  %2109 = vst.msk [vmem:[#allocation3 + $0x268] sm:$0xff] %vm679_vm2, %v3933_v36  ;;  %v3971_v40 = vld [vmem:[#allocation2 + $0x158] sm:$0xff] }
 0x161   : > { %1113 = vrot.lane.b32.xlu0 %v3624_v53, %s3209_s12  ;;  %v907_v26 = vpop.permute.xlu1 %906  ;;  %829 = vst.msk [vmem:[#allocation3 + $0x2b8] sm:$0xff] %vm679_vm2, %v3971_v40 }
 0x162   : > { %998 = vst.msk [vmem:[#allocation3 + $0x78] sm:$0xff] %vm992_vm4, %v907_v26  ;;  %v3942_v7 = vld [vmem:[#allocation2 + $0x13a] sm:$0xff]  ;;  %v3944_v53 = vld [vmem:[#allocation2 + $0x142] sm:$0xff] }
 0x163   : > { %v3935_v63 = vpop.permute.xlu0 %1924  ;;  %1300 = vrot.lane.b32.xlu1 %v1675_v43, %s3210_s15  ;;  %2106 = vst.msk [vmem:[#allocation3 + $0x220] sm:$0xff] %vm679_vm2, %v3942_v7  ;;  %2107 = vst.msk [vmem:[#allocation3 + $0x238] sm:$0xff] %vm679_vm2, %v3944_v53  ;;  %v3962_v55 = vld [vmem:[#allocation2 + $0x140] sm:$0xff] }
 0x164   : > { %827 = vst.msk [vmem:[#allocation3 + $0x288] sm:$0xff] %vm679_vm2, %v3962_v55  ;;  %v3988_v43 = vld [vmem:[#allocation2 + $0x159] sm:$0xff] }
 0x165   : > { %1555 = vrot.lane.b32.xlu0 %v3643_v59, %s3208_s11  ;;  %v1100_v38 = vpop.permute.xlu1 %1099  ;;  %1470 = vst.msk [vmem:[#allocation3 + $0x290] sm:$0xff] %vm679_vm2, %v3988_v43 }
 0x166   : > { %1191 = vst.msk [vmem:[#allocation3 + $0x78] sm:$0xff] %vm1185_vm5, %v1100_v38 }
 0x167   : > { %v1283_v12 = vpop.permute.xlu0 %1282  ;;  %918 = vrot.lane.b32.xlu1 %v3655_v61, %s3208_s11  ;;  %v3967_v61 = vld [vmem:[#allocation2 + $0x141] sm:$0xff] }
 0x168   : > { %1379 = vst.msk [vmem:[#allocation3] sm:$0xff] %vm1378_vm6, %v1283_v12 }
 0x169   : > { %1109 = vrot.lane.b32.xlu0 %v3643_v59, %s3209_s12  ;;  %v1735_v33 = vpop.permute.xlu1 %1734  ;;  %1468 = vst.msk [vmem:[#allocation3 + $0x260] sm:$0xff] %vm679_vm2, %v3967_v61 }
 0x16b   : > { %v1544_v31 = vpop.permute.xlu0 %1543  ;;  %1111 = vrot.lane.b32.xlu1 %v3645_v60, %s3209_s12  ;;  %v3980_v60 = vld [vmem:[#allocation2 + $0x151] sm:$0xff] }
 0x16c   : > { %1637 = vst.msk [vmem:[#allocation3 + $0x38] sm:$0xff] %vm992_vm4, %v1544_v31 }
 0x16d   : > { %1756 = vrot.lane.b32.xlu0 %v1680_v30, %s3209_s12  ;;  %v1927_v59 = vpop.permute.xlu1 %1926  ;;  %1469 = vst.msk [vmem:[#allocation3 + $0x278] sm:$0xff] %vm679_vm2, %v3980_v60 }
 0x16f   : > { %v1546_v44 = vpop.permute.xlu0 %1545  ;;  %1758 = vrot.lane.b32.xlu1 %v1681_v42, %s3209_s12 }
 0x170   : > { %1638 = vst.msk [vmem:[#allocation3 + $0x50] sm:$0xff] %vm992_vm4, %v1546_v44 }
 0x171   : > { %1948 = vrot.lane.b32.xlu0 %v1872_v11, %s3210_s15  ;;  %v903_v46 = vpop.permute.xlu1 %902 }
 0x172   : > { %996 = vst.msk [vmem:[#allocation3 + $0x48] sm:$0xff] %vm992_vm4, %v903_v46 }
 0x173   : > { %v1098_v21 = vpop.permute.xlu0 %1097  ;;  %1950 = vrot.lane.b32.xlu1 %v3690_v9, %s3210_s15 }
 0x174   : > { %1190 = vst.msk [vmem:[#allocation3 + $0x60] sm:$0xff] %vm1185_vm5, %v1098_v21  ;;  %v1679_v21 = vld [vmem:[#allocation2 + $0xb0] sm:$0xff] }
 0x175   : > { %1310 = vrot.lane.b32.xlu0 %v1680_v30, %s3210_s15  ;;  %v1096_v54 = vpop.permute.xlu1 %1095  ;;  %v2121_v30 = vld [vmem:[#allocation3 + $0x28] sm:$0xff] }
 0x176   : > { %1189 = vst.msk [vmem:[#allocation3 + $0x48] sm:$0xff] %vm1185_vm5, %v1096_v54 }
 0x177   : > { %1382 = vst.msk [vmem:[#allocation3 + $0x48] sm:$0xff] %vm1378_vm6, %v1289_v1  ;;  %v1094_v48 = vpop.permute.xlu0 %1093  ;;  %1569 = vrot.lane.b32.xlu1 %v3680_v10, %s3208_s11  ;;  %v1870_v1 = vld [vmem:[#allocation2 + $0xa9] sm:$0xff] }
 0x178   : > { %1188 = vst.msk [vmem:[#allocation3 + $0x30] sm:$0xff] %vm1185_vm5, %v1094_v48 }
 0x179   : > { %1381 = vst.msk [vmem:[#allocation3 + $0x30] sm:$0xff] %vm1378_vm6, %v3909_v45  ;;  %928 = vrot.lane.b32.xlu0 %v1872_v11, %s3208_s11  ;;  %v1542_v27 = vpop.permute.xlu1 %1541 }
 0x17a   : > { %1636 = vst.msk [vmem:[#allocation3 + $0x20] sm:$0xff] %vm992_vm4, %v1542_v27 }
 0x17b   : > { %1829 = vst.msk [vmem:[#allocation3 + $0x20] sm:$0xff] %vm1185_vm5, %v1735_v33  ;;  %v1540_v22 = vpop.permute.xlu0 %1539  ;;  %1312 = vrot.lane.b32.xlu1 %v1681_v42, %s3210_s15  ;;  %v2118_v33 = vld [vmem:[#allocation3 + $0x10] sm:$0xff] }
 0x17c   : > { %2021 = vst.msk [vmem:[#allocation3 + $0x20] sm:$0xff] %vm1378_vm6, %v1927_v59 }
 0x17d   : > { %1635 = vst.msk [vmem:[#allocation3 + $0x8] sm:$0xff] %vm992_vm4, %v1540_v22  ;;  %1752 = vrot.lane.b32.xlu0 %v3668_v2, %s3209_s12  ;;  %v1285_v45 = vpop.permute.xlu1 %1284 }
 0x17e   : > { %1828 = vst.msk [vmem:[#allocation3 + $0x8] sm:$0xff] %vm1185_vm5, %v3924_v5  ;;  %v3112_v5 = vpop.f32.mrf.mxu0 }
 0x17f   : > { %2020 = vst.msk [vmem:[#allocation3 + $0x8] sm:$0xff] %vm1378_vm6, %v3935_v63  ;;  %1380 = vst.msk [vmem:[#allocation3 + $0x18] sm:$0xff] %vm1378_vm6, %v1285_v45  ;;  %v4022_v3 = vpop.permute.xlu0 %1740  ;;  %930 = vrot.lane.b32.xlu1 %v3690_v9, %s3208_s11  ;;  %v641_v38 = vadd.f32 %v3112_v5, %v3458_v34  ;;  %v2116_v63 = vld [vmem:[#allocation3] sm:$0xff]  ;;  %v2214_v5 = vpack.c.bf16 %v2121_v30, %v2118_v33  ;;  %v2127_v30 = vld [vmem:[#allocation3 + $0x58] sm:$0xff] }
 0x180   : > { %v632_v59 = vpop.f32.mrf.mxu0  ;;  %v2124_v33 = vld [vmem:[#allocation3 + $0x40] sm:$0xff] }
 0x181   : > { %1944 = vrot.lane.b32.xlu0 %v1870_v1, %s3210_s15  ;;  %v4027_v26 = vpop.permute.xlu1 %1742  ;;  %v677_v31 = vmax.f32 %v641_v38, 0.0  ;;  %v633_v46 = vadd.f32 %v3458_v34, %v632_v59 }
 0x183   : > { %v4030_v12 = vpop.permute.xlu0 %1932  ;;  %1123 = vrot.lane.b32.xlu1 %v3680_v10, %s3209_s12  ;;  %v2120_v44 = vld [vmem:[#allocation3 + $0x20] sm:$0xff]  ;;  %766 = vst.msk [vmem:[#allocation2 + $0x181] sm:$0xff] %vm679_vm2, %v677_v31  ;;  %v3113_v10 = vpop.f32.mrf.mxu0  ;;  %v675_v22 = vmax.f32 %v633_v46, 0.0  ;;  %v2217_v46 = vpack.c.bf16 %v2127_v30, %v2124_v33 }
 0x184   : > { %v644_v45 = vadd.f32 %v3113_v10, %v3458_v34 }
 0x185   : > { %1306 = vrot.lane.b32.xlu0 %v3668_v2, %s3210_s15  ;;  %v4036_v9 = vpop.permute.xlu1 %1934  ;;  %v3198_v2 = vld [vmem:[%s4639_s5 + $0x80] sm:$0xff]   ;;  %v635_v38 = vpop.f32.mrf.mxu0  ;;  %764 = vst.msk [vmem:[#allocation2 + $0x169] sm:$0xff] %vm679_vm2, %v675_v22 }
 0x186   : > { %v2117_v42 = vld [vmem:[#allocation3 + $0x8] sm:$0xff]  ;;  %v2119_v11 = vld [vmem:[#allocation3 + $0x18] sm:$0xff]  ;;  %v678_v31 = vmax.f32 %v644_v45, 0.0  ;;  %v636_v59 = vadd.f32 %v3458_v34, %v635_v38  ;;  %v2136_v45 = vld [vmem:[#allocation3 + $0xa0] sm:$0xff] }
 0x187   : > { %v2213_v54 = vpack.c.bf16 %v2120_v44, %v2117_v42  ;;  %v2212_v48 = vpack.c.bf16 %v2119_v11, %v2116_v63  ;;  %v4040_v27 = vpop.permute.xlu0 %1294  ;;  %1754 = vrot.lane.b32.xlu1 %v1679_v21, %s3209_s12  ;;  %v2133_v44 = vld [vmem:[#allocation3 + $0x88] sm:$0xff] }
 0x188   : > { %767 = vst.msk [vmem:[#allocation2 + $0x189] sm:$0xff] %vm679_vm2, %v678_v31  ;;  %v2142_v31 = vld [vmem:[#allocation3 + $0xd0] sm:$0xff] }
 0x189   : > { %2484 = vmatprep.mubr.bf16.mxu0 %v2213_v54  ;;  %924 = vrot.lane.b32.xlu0 %v1870_v1, %s3208_s11  ;;  %v1554_v63 = vpop.permute.xlu1 %1553  ;;  %v676_v1 = vmax.f32 %v636_v59, 0.0 }
 0x18a   : > { %2485 = vmatmul.mubr.bf16.vlgmr.msra.gmra.mxu0 %v2212_v48  ;;  %1642 = vst.msk [vmem:[#allocation3 + $0xb0] sm:$0xff] %vm992_vm4, %v1554_v63 }
 0x18b   : > { %3115 = vmatpush3.bf16.msra.mxu0 %v3726_v4  ;;  %3118 = vmatprep.mubr.msk.bf16.mxu0 %vm679_vm2, %v2214_v5  ;;  %v913_v42 = vpop.permute.xlu0 %912  ;;  %v2130_v4 = vld [vmem:[#allocation3 + $0x70] sm:$0xff]  ;;  %765 = vst.msk [vmem:[#allocation2 + $0x171] sm:$0xff] %vm679_vm2, %v676_v1 }
 0x18c   : > { %1946 = vrot.lane.b32.xlu1 %v3709_v18, %s3210_s15  ;;  %3116 = vmatprep.subr.bf16.mxu0 %v3198_v2  ;;  %1001 = vst.msk [vmem:[#allocation3 + $0xc0] sm:$0xff] %vm992_vm4, %v913_v42  ;;  %v2220_v54 = vpack.c.bf16 %v2133_v44, %v2130_v4  ;;  %v2148_v4 = vld [vmem:[#allocation3 + $0x100] sm:$0xff] }
 0x18d   : > { %1567 = vrot.lane.b32.xlu0 %v3678_v8, %s3208_s11  ;;  %v4059_v34 = vpop.permute.xlu1 %1296 }
 0x18f   : > { %3117 = vmatpush3.bf16.msra.mxu0 %v3198_v2  ;;  %v1737_v11 = vpop.permute.xlu0 %1736  ;;  %v4070_v10 = vld [vmem:[#allocation2 + $0x182] sm:$0xff]  ;;  %v4072_v2 = vld [vmem:[#allocation2 + $0x18a] sm:$0xff] }
 0x190   : > { %1565 = vrot.lane.b32.xlu1 %v3697_v17, %s3208_s11  ;;  %1830 = vst.msk [vmem:[#allocation3 + $0x38] sm:$0xff] %vm1185_vm5, %v1737_v11  ;;  %v2151_v11 = vld [vmem:[#allocation3 + $0x118] sm:$0xff] }
 0x191   : > { %1121 = vrot.lane.b32.xlu0 %v3678_v8, %s3209_s12  ;;  %v915_v48 = vpop.permute.xlu1 %914  ;;  %2112 = vst.msk [vmem:[#allocation3 + $0x2b0] sm:$0xff] %vm679_vm2, %v4070_v10  ;;  %2113 = vst.msk [vmem:[#allocation3 + $0x2c8] sm:$0xff] %vm679_vm2, %v4072_v2  ;;  %v2139_v8 = vld [vmem:[#allocation3 + $0xb8] sm:$0xff] }
 0x192   : > { %3119 = vmatmul.mubr.msk.bf16.vlgmr.msra.gmra.mxu0 %vm679_vm2, %v2217_v46  ;;  %1002 = vst.msk [vmem:[#allocation3 + $0xd8] sm:$0xff] %vm992_vm4, %v915_v48  ;;  %v4080_v5 = vld [vmem:[#allocation2 + $0x16a] sm:$0xff]  ;;  %v4082_v38 = vld [vmem:[#allocation2 + $0x172] sm:$0xff]  ;;  %v2223_v42 = vpack.c.bf16 %v2139_v8, %v2136_v45 }
 0x193   : > { %3122 = vmatprep.mubr.msk.bf16.mxu0 %vm679_vm2, %v2220_v54  ;;  %v1929_v22 = vpop.permute.xlu0 %1928  ;;  %2110 = vst.msk [vmem:[#allocation3 + $0x280] sm:$0xff] %vm679_vm2, %v4080_v5  ;;  %2111 = vst.msk [vmem:[#allocation3 + $0x298] sm:$0xff] %vm679_vm2, %v4082_v38  ;;  %v4103_v44 = vld [vmem:[#allocation2 + $0x170] sm:$0xff]  ;;  %v2154_v54 = vld [vmem:[#allocation3 + $0x130] sm:$0xff] }
 0x194   : > { %1308 = vrot.lane.b32.xlu1 %v1679_v21, %s3210_s15  ;;  %2022 = vst.msk [vmem:[#allocation3 + $0x38] sm:$0xff] %vm1378_vm6, %v1929_v22  ;;  %v2145_v21 = vld [vmem:[#allocation3 + $0xe8] sm:$0xff]  ;;  %v4121_v22 = vld [vmem:[#allocation2 + $0x181] sm:$0xff]  ;;  %v4123_v45 = vld [vmem:[#allocation2 + $0x189] sm:$0xff] }
 0x195   : > { %1563 = vrot.lane.b32.xlu0 %v3695_v16, %s3208_s11  ;;  %v1108_v63 = vpop.permute.xlu1 %1107  ;;  %v2226_v1 = vpack.c.bf16 %v2145_v21, %v2142_v31  ;;  %v4108_v46 = vld [vmem:[#allocation2 + $0x171] sm:$0xff]  ;;  %831 = vst.msk [vmem:[#allocation3 + $0x2e8] sm:$0xff] %vm679_vm2, %v4103_v44  ;;  %1473 = vst.msk [vmem:[#allocation3 + $0x2d8] sm:$0xff] %vm679_vm2, %v4121_v22 }
 0x196   : > { %1195 = vst.msk [vmem:[#allocation3 + $0xd8] sm:$0xff] %vm1185_vm5, %v1108_v63  ;;  %v2157_v48 = vld [vmem:[#allocation3 + $0x148] sm:$0xff]  ;;  %v2229_v63 = vpack.c.bf16 %v2151_v11, %v2148_v4 }
 0x197   : > { %v1291_v59 = vpop.permute.xlu0 %1290  ;;  %1472 = vst.msk [vmem:[#allocation3 + $0x2c0] sm:$0xff] %vm679_vm2, %v4108_v46  ;;  %1474 = vst.msk [vmem:[#allocation3 + $0x2f0] sm:$0xff] %vm679_vm2, %v4123_v45  ;;  %v2232_v31 = vpack.c.bf16 %v2157_v48, %v2154_v54 }
 0x198   : > { %926 = vrot.lane.b32.xlu1 %v3709_v18, %s3208_s11  ;;  %1383 = vst.msk [vmem:[#allocation3 + $0x60] sm:$0xff] %vm1378_vm6, %v1291_v59  ;;  %v4101_v18 = vld [vmem:[#allocation2 + $0x168] sm:$0xff] }
 0x199   : > { %1117 = vrot.lane.b32.xlu0 %v3695_v16, %s3209_s12  ;;  %v1739_v33 = vpop.permute.xlu1 %1738  ;;  %v4106_v16 = vld [vmem:[#allocation2 + $0x169] sm:$0xff]  ;;  %830 = vst.msk [vmem:[#allocation3 + $0x2d0] sm:$0xff] %vm679_vm2, %v4101_v18 }
 0x19a   : > { %3123 = vmatmul.mubr.msk.bf16.gmra.mxu0 %vm679_vm2, %v2223_v42  ;;  %1831 = vst.msk [vmem:[#allocation3 + $0x50] sm:$0xff] %vm1185_vm5, %v1739_v33  ;;  %v2160_v42 = vld [vmem:[#allocation3 + $0x160] sm:$0xff]  ;;  %v2166_v33 = vld [vmem:[#allocation3 + $0x190] sm:$0xff] }
 0x19b   : > { %3126 = vmatprep.mubr.msk.bf16.mxu0 %vm679_vm2, %v2226_v1  ;;  %v909_v30 = vpop.permute.xlu0 %908  ;;  %1471 = vst.msk [vmem:[#allocation3 + $0x2a8] sm:$0xff] %vm679_vm2, %v4106_v16  ;;  %v2163_v1 = vld [vmem:[#allocation3 + $0x178] sm:$0xff] }
 0x19c   : > { %1119 = vrot.lane.b32.xlu1 %v3697_v17, %s3209_s12  ;;  %999 = vst.msk [vmem:[#allocation3 + $0x90] sm:$0xff] %vm992_vm4, %v909_v30  ;;  %v2169_v30 = vld [vmem:[#allocation3 + $0x1a8] sm:$0xff]  ;;  %v2123_v11 = vld [vmem:[#allocation3 + $0x38] sm:$0xff] }
 0x19d   : > { %1764 = vrot.lane.b32.xlu0 %v3771_v14, %s3209_s12  ;;  %v1931_v17 = vpop.permute.xlu1 %1930 }
 0x19e   : > { %2023 = vst.msk [vmem:[#allocation3 + $0x50] sm:$0xff] %vm1378_vm6, %v1931_v17 }
 0x19f   : > { %v1552_v8 = vpop.permute.xlu0 %1551 }
 0x1a0   : > { %1766 = vrot.lane.b32.xlu1 %v3775_v15, %s3209_s12  ;;  %1641 = vst.msk [vmem:[#allocation3 + $0x98] sm:$0xff] %vm992_vm4, %v1552_v8  ;;  %v2125_v8 = vld [vmem:[#allocation3 + $0x48] sm:$0xff] }
 0x1a1   : > { %1956 = vrot.lane.b32.xlu0 %v3777_v52, %s3210_s15  ;;  %v1550_v21 = vpop.permute.xlu1 %1549 }
 0x1a2   : > { %3127 = vmatmul.mubr.msk.bf16.gmra.mxu0 %vm679_vm2, %v2229_v63  ;;  %1640 = vst.msk [vmem:[#allocation3 + $0x80] sm:$0xff] %vm992_vm4, %v1550_v21  ;;  %v2172_v21 = vld [vmem:[#allocation3 + $0x1c0] sm:$0xff] }
 0x1a3   : > { %3130 = vmatprep.mubr.msk.bf16.mxu0 %vm679_vm2, %v2232_v31  ;;  %1833 = vst.msk [vmem:[#allocation3 + $0x80] sm:$0xff] %vm1185_vm5, %v4027_v26  ;;  %v1106_v59 = vpop.permute.xlu0 %1105  ;;  %v2122_v26 = vld [vmem:[#allocation3 + $0x30] sm:$0xff]  ;;  %v2238_v31 = vpack.c.bf16 %v2169_v30, %v2166_v33 }
 0x1a4   : > { %1958 = vrot.lane.b32.xlu1 %v3779_v56, %s3210_s15  ;;  %2025 = vst.msk [vmem:[#allocation3 + $0x80] sm:$0xff] %vm1378_vm6, %v4036_v9  ;;  %v2235_v9 = vpack.c.bf16 %v2163_v1, %v2160_v42  ;;  %v2215_v63 = vpack.c.bf16 %v2125_v8, %v2122_v26  ;;  %v2181_v1 = vld [vmem:[#allocation3 + $0x208] sm:$0xff]  ;;  %v2128_v26 = vld [vmem:[#allocation3 + $0x60] sm:$0xff] }
 0x1a5   : > { %1194 = vst.msk [vmem:[#allocation3 + $0xc0] sm:$0xff] %vm1185_vm5, %v1106_v59  ;;  %1318 = vrot.lane.b32.xlu0 %v3771_v14, %s3210_s15  ;;  %v1293_v4 = vpop.permute.xlu1 %1292  ;;  %v2126_v17 = vld [vmem:[#allocation3 + $0x50] sm:$0xff]  ;;  %v2175_v59 = vld [vmem:[#allocation3 + $0x1d8] sm:$0xff]  ;;  %v2193_v8 = vld [vmem:[#allocation3 + $0x268] sm:$0xff] }
 0x1a6   : > { %1384 = vst.msk [vmem:[#allocation3 + $0x78] sm:$0xff] %vm1378_vm6, %v1293_v4  ;;  %v2216_v54 = vpack.c.bf16 %v2126_v17, %v2123_v11 }
 0x1a7   : > { %v1548_v48 = vpop.permute.xlu0 %1547 }
 0x1a8   : > { %1577 = vrot.lane.b32.xlu1 %v3753_v49, %s3208_s11  ;;  %1639 = vst.msk [vmem:[#allocation3 + $0x68] sm:$0xff] %vm992_vm4, %v1548_v48  ;;  %2492 = vmatprep.mubr.bf16.mxu1 %v2216_v54  ;;  %v2187_v54 = vld [vmem:[#allocation3 + $0x238] sm:$0xff] }
 0x1a9   : > { %1832 = vst.msk [vmem:[#allocation3 + $0x68] sm:$0xff] %vm1185_vm5, %v4022_v3  ;;  %936 = vrot.lane.b32.xlu0 %v3777_v52, %s3208_s11  ;;  %v911_v14 = vpop.permute.xlu1 %910  ;;  %2493 = vmatmul.mubr.bf16.vlgmr.msra.gmra.mxu1 %v2215_v63  ;;  %v2178_v3 = vld [vmem:[#allocation3 + $0x1f0] sm:$0xff] }
 0x1aa   : > { %3131 = vmatmul.mubr.msk.bf16.gmra.mxu0 %vm679_vm2, %v2235_v9  ;;  %2024 = vst.msk [vmem:[#allocation3 + $0x68] sm:$0xff] %vm1378_vm6, %v4030_v12  ;;  %v2241_v12 = vpack.c.bf16 %v2175_v59, %v2172_v21  ;;  %v2244_v33 = vpack.c.bf16 %v2181_v1, %v2178_v3  ;;  %v2190_v9 = vld [vmem:[#allocation3 + $0x250] sm:$0xff]  ;;  %v2199_v59 = vld [vmem:[#allocation3 + $0x298] sm:$0xff]  ;;  %v2205_v1 = vld [vmem:[#allocation3 + $0x2c8] sm:$0xff] }
 0x1ab   : > { %1000 = vst.msk [vmem:[#allocation3 + $0xa8] sm:$0xff] %vm992_vm4, %v911_v14  ;;  %3134 = vmatprep.mubr.msk.bf16.mxu0 %vm679_vm2, %v2238_v31  ;;  %v1102_v42 = vpop.permute.xlu0 %1101  ;;  %v2132_v11 = vld [vmem:[#allocation3 + $0x80] sm:$0xff]  ;;  %v2250_v14 = vpack.c.bf16 %v2193_v8, %v2190_v9  ;;  %v2202_v3 = vld [vmem:[#allocation3 + $0x2b0] sm:$0xff] }
 0x1ac   : > { %1320 = vrot.lane.b32.xlu1 %v3775_v15, %s3210_s15  ;;  %1192 = vst.msk [vmem:[#allocation3 + $0x90] sm:$0xff] %vm1185_vm5, %v1102_v42 }
 0x1ad   : > { %1385 = vst.msk [vmem:[#allocation3 + $0x90] sm:$0xff] %vm1378_vm6, %v4040_v27  ;;  %1760 = vrot.lane.b32.xlu0 %v3783_v28, %s3209_s12  ;;  %v1104_v52 = vpop.permute.xlu1 %1103  ;;  %v2131_v15 = vld [vmem:[#allocation3 + $0x78] sm:$0xff] }
 0x1ae   : > { %1193 = vst.msk [vmem:[#allocation3 + $0xa8] sm:$0xff] %vm1185_vm5, %v1104_v52 }
 0x1af   : > { %1386 = vst.msk [vmem:[#allocation3 + $0xa8] sm:$0xff] %vm1378_vm6, %v4059_v34  ;;  %v4169_v30 = vpop.permute.xlu0 %1748  ;;  %v2184_v34 = vld [vmem:[#allocation3 + $0x220] sm:$0xff] }
 0x1b0   : > { %938 = vrot.lane.b32.xlu1 %v3779_v56, %s3208_s11  ;;  %v2218_v56 = vpack.c.bf16 %v2131_v15, %v2128_v26  ;;  %v2247_v31 = vpack.c.bf16 %v2187_v54, %v2184_v34  ;;  %v4224_v26 = vld [vmem:[#allocation2 + $0x120] sm:$0xff]  ;;  %v4229_v34 = vld [vmem:[#allocation2 + $0x128] sm:$0xff] }
 0x1b1   : > { %1952 = vrot.lane.b32.xlu0 %v3785_v57, %s3210_s15  ;;  %v4175_v27 = vpop.permute.xlu1 %1750  ;;  %v2129_v4 = vld [vmem:[#allocation3 + $0x68] sm:$0xff] }
 0x1b2   : > { %3135 = vmatmul.mubr.msk.bf16.gmra.mxu0 %vm679_vm2, %v2241_v12  ;;  %v2219_v17 = vpack.c.bf16 %v2132_v11, %v2129_v4  ;;  %v2256_v12 = vpack.c.bf16 %v2205_v1, %v2202_v3 }
 0x1b3   : > { %3138 = vmatprep.mubr.msk.bf16.mxu0 %vm679_vm2, %v2244_v33  ;;  %v4179_v48 = vpop.permute.xlu0 %1940 }
 0x1b4   : > { %1131 = vrot.lane.b32.xlu1 %v3753_v49, %s3209_s12  ;;  %2500 = vmatprep.mubr.bf16.mxu1 %v2219_v17 }
 0x1b5   : > { %1314 = vrot.lane.b32.xlu0 %v3783_v28, %s3210_s15  ;;  %v1943_v63 = vpop.permute.xlu1 %1942  ;;  %2501 = vmatmul.mubr.bf16.gmra.mxu1 %v2218_v56  ;;  %v2196_v28 = vld [vmem:[#allocation3 + $0x280] sm:$0xff] }
 0x1b6   : > { %v2253_v52 = vpack.c.bf16 %v2199_v59, %v2196_v28  ;;  %v2137_v56 = vld [vmem:[#allocation3 + $0xa8] sm:$0xff] }
 0x1b7   : > { %v4185_v21 = vpop.permute.xlu0 %1302 }
 0x1b8   : > { %1762 = vrot.lane.b32.xlu1 %v3787_v58, %s3209_s12 }
 0x1b9   : > { %932 = vrot.lane.b32.xlu0 %v3785_v57, %s3208_s11  ;;  %v1562_v49 = vpop.permute.xlu1 %1561 }
 0x1ba   : > { %3139 = vmatmul.mubr.msk.bf16.gmra.mxu0 %vm679_vm2, %v2247_v31  ;;  %1646 = vst.msk [vmem:[#allocation3 + $0x110] sm:$0xff] %vm992_vm4, %v1562_v49  ;;  %v2134_v49 = vld [vmem:[#allocation3 + $0x90] sm:$0xff] }
 0x1bb   : > { %3142 = vmatprep.mubr.msk.bf16.mxu0 %vm679_vm2, %v2250_v14  ;;  %v921_v42 = vpop.permute.xlu0 %920  ;;  %v2221_v28 = vpack.c.bf16 %v2137_v56, %v2134_v49 }
 0x1bc   : > { %1954 = vrot.lane.b32.xlu1 %v3797_v0, %s3210_s15  ;;  %1005 = vst.msk [vmem:[#allocation3 + $0x120] sm:$0xff] %vm992_vm4, %v921_v42 }
 0x1bd   : > { %1575 = vrot.lane.b32.xlu0 %v3751_v47, %s3208_s11  ;;  %v4199_v57 = vpop.permute.xlu1 %1304 }
 0x1bf   : > { %v1745_v33 = vpop.permute.xlu0 %1744 }
 0x1c0   : > { %1573 = vrot.lane.b32.xlu1 %v3763_v51, %s3208_s11  ;;  %1834 = vst.msk [vmem:[#allocation3 + $0x98] sm:$0xff] %vm1185_vm5, %v1745_v33 }
 0x1c1   : > { %1129 = vrot.lane.b32.xlu0 %v3751_v47, %s3209_s12  ;;  %v923_v15 = vpop.permute.xlu1 %922 }
 0x1c2   : > { %3143 = vmatmul.mubr.msk.bf16.gmra.mxu0 %vm679_vm2, %v2253_v52  ;;  %1006 = vst.msk [vmem:[#allocation3 + $0x138] sm:$0xff] %vm992_vm4, %v923_v15 }
 0x1c3   : > { %3146 = vmatprep.mubr.msk.bf16.mxu0 %vm679_vm2, %v2256_v12  ;;  %v1937_v4 = vpop.permute.xlu0 %1936 }
 0x1c4   : > { %1316 = vrot.lane.b32.xlu1 %v3787_v58, %s3210_s15  ;;  %2026 = vst.msk [vmem:[#allocation3 + $0x98] sm:$0xff] %vm1378_vm6, %v1937_v4 }
 0x1c5   : > { %1571 = vrot.lane.b32.xlu0 %v3761_v50, %s3208_s11  ;;  %v1116_v11 = vpop.permute.xlu1 %1115 }
 0x1c6   : > { %1199 = vst.msk [vmem:[#allocation3 + $0x138] sm:$0xff] %vm1185_vm5, %v1116_v11 }
 0x1c7   : > { %v1299_v47 = vpop.permute.xlu0 %1298 }
 0x1c8   : > { %934 = vrot.lane.b32.xlu1 %v3797_v0, %s3208_s11  ;;  %1387 = vst.msk [vmem:[#allocation3 + $0xc0] sm:$0xff] %vm1378_vm6, %v1299_v47 }
 0x1c9   : > { %1125 = vrot.lane.b32.xlu0 %v3761_v50, %s3209_s12  ;;  %v1747_v17 = vpop.permute.xlu1 %1746 }
 0x1ca   : > { %1835 = vst.msk [vmem:[#allocation3 + $0xb0] sm:$0xff] %vm1185_vm5, %v1747_v17 }
 0x1cb   : > { %v917_v58 = vpop.permute.xlu0 %916  ;;  %v2135_v8 = vld [vmem:[#allocation3 + $0x98] sm:$0xff] }
 0x1cc   : > { %1127 = vrot.lane.b32.xlu1 %v3763_v51, %s3209_s12  ;;  %1003 = vst.msk [vmem:[#allocation3 + $0xf0] sm:$0xff] %vm992_vm4, %v917_v58 }
 0x1cd   : > { %1772 = vrot.lane.b32.xlu0 %v4224_v26, %s3209_s12  ;;  %v1939_v0 = vpop.permute.xlu1 %1938 }
 0x1ce   : > { %2027 = vst.msk [vmem:[#allocation3 + $0xb0] sm:$0xff] %vm1378_vm6, %v1939_v0 }
 0x1cf   : > { %v1560_v50 = vpop.permute.xlu0 %1559 }
 0x1d0   : > { %1774 = vrot.lane.b32.xlu1 %v4229_v34, %s3209_s12  ;;  %1645 = vst.msk [vmem:[#allocation3 + $0xf8] sm:$0xff] %vm992_vm4, %v1560_v50 }
 0x1d1   : > { %1964 = vrot.lane.b32.xlu0 %v3873_v41, %s3210_s15  ;;  %v1558_v51 = vpop.permute.xlu1 %1557 }
 0x1d2   : > { %1644 = vst.msk [vmem:[#allocation3 + $0xe0] sm:$0xff] %vm992_vm4, %v1558_v51 }
 0x1d3   : > { %1837 = vst.msk [vmem:[#allocation3 + $0xe0] sm:$0xff] %vm1185_vm5, %v4175_v27  ;;  %v1114_v54 = vpop.permute.xlu0 %1113 }
 0x1d4   : > { %1966 = vrot.lane.b32.xlu1 %v3875_v20, %s3210_s15  ;;  %2029 = vst.msk [vmem:[#allocation3 + $0xe0] sm:$0xff] %vm1378_vm6, %v1943_v63 }
 0x1d5   : > { %1198 = vst.msk [vmem:[#allocation3 + $0x120] sm:$0xff] %vm1185_vm5, %v1114_v54  ;;  %1768 = vrot.lane.b32.xlu0 %v3877_v23, %s3209_s12  ;;  %v1301_v9 = vpop.permute.xlu1 %1300  ;;  %v2138_v31 = vld [vmem:[#allocation3 + $0xb0] sm:$0xff] }
 0x1d6   : > { %1388 = vst.msk [vmem:[#allocation3 + $0xd8] sm:$0xff] %vm1378_vm6, %v1301_v9  ;;  %v2222_v14 = vpack.c.bf16 %v2138_v31, %v2135_v8 }
 0x1d7   : > { %v1556_v27 = vpop.permute.xlu0 %1555 }
 0x1d8   : > { %1585 = vrot.lane.b32.xlu1 %v3851_v35, %s3208_s11  ;;  %1643 = vst.msk [vmem:[#allocation3 + $0xc8] sm:$0xff] %vm992_vm4, %v1556_v27  ;;  %2508 = vmatprep.mubr.bf16.mxu1 %v2222_v14 }
 0x1d9   : > { %1836 = vst.msk [vmem:[#allocation3 + $0xc8] sm:$0xff] %vm1185_vm5, %v4169_v30  ;;  %1960 = vrot.lane.b32.xlu0 %v3879_v24, %s3210_s15  ;;  %v919_v63 = vpop.permute.xlu1 %918  ;;  %2509 = vmatmul.mubr.bf16.gmra.mxu1 %v2221_v28 }
 0x1da   : > { %2028 = vst.msk [vmem:[#allocation3 + $0xc8] sm:$0xff] %vm1378_vm6, %v4179_v48 }
 0x1db   : > { %1004 = vst.msk [vmem:[#allocation3 + $0x108] sm:$0xff] %vm992_vm4, %v919_v63  ;;  %v1110_v59 = vpop.permute.xlu0 %1109  ;;  %v2144_v1 = vld [vmem:[#allocation3 + $0xe0] sm:$0xff] }
 0x1dc   : > { %1770 = vrot.lane.b32.xlu1 %v3881_v25, %s3209_s12  ;;  %1196 = vst.msk [vmem:[#allocation3 + $0xf0] sm:$0xff] %vm1185_vm5, %v1110_v59 }
 0x1dd   : > { %1389 = vst.msk [vmem:[#allocation3 + $0xf0] sm:$0xff] %vm1378_vm6, %v4185_v21  ;;  %1322 = vrot.lane.b32.xlu0 %v3877_v23, %s3210_s15  ;;  %v1112_v30 = vpop.permute.xlu1 %1111  ;;  %v2143_v42 = vld [vmem:[#allocation3 + $0xd8] sm:$0xff]  ;;  %v2140_v23 = vld [vmem:[#allocation3 + $0xc0] sm:$0xff] }
 0x1de   : > { %1197 = vst.msk [vmem:[#allocation3 + $0x108] sm:$0xff] %vm1185_vm5, %v1112_v30 }
 0x1df   : > { %1390 = vst.msk [vmem:[#allocation3 + $0x108] sm:$0xff] %vm1378_vm6, %v4199_v57  ;;  %v4266_v48 = vpop.permute.xlu0 %1756  ;;  %v2224_v57 = vpack.c.bf16 %v2143_v42, %v2140_v23 }
 0x1e0   : > { %1962 = vrot.lane.b32.xlu1 %v3889_v29, %s3210_s15 }
 0x1e1   : > { %1583 = vrot.lane.b32.xlu0 %v3849_v13, %s3208_s11  ;;  %v1759_v3 = vpop.permute.xlu1 %1758  ;;  %v2141_v21 = vld [vmem:[#allocation3 + $0xc8] sm:$0xff] }
 0x1e2   : > { %v2225_v52 = vpack.c.bf16 %v2144_v1, %v2141_v21 }
 0x1e3   : > { %v4272_v12 = vpop.permute.xlu0 %1948 }
 0x1e4   : > { %1581 = vrot.lane.b32.xlu1 %v3861_v19, %s3208_s11  ;;  %2516 = vmatprep.mubr.bf16.mxu1 %v2225_v52  ;;  %v2146_v8 = vld [vmem:[#allocation3 + $0xf0] sm:$0xff] }
 0x1e5   : > { %1579 = vrot.lane.b32.xlu0 %v3859_v62, %s3208_s11  ;;  %v1951_v33 = vpop.permute.xlu1 %1950  ;;  %2517 = vmatmul.mubr.bf16.gmra.mxu1 %v2224_v57 }
 0x1e6   : > { %v2149_v51 = vld [vmem:[#allocation3 + $0x108] sm:$0xff] }
 0x1e7   : > { %v4278_v15 = vpop.permute.xlu0 %1310 }
 0x1e8   : > { %1324 = vrot.lane.b32.xlu1 %v3881_v25, %s3210_s15 }
 0x1e9   : > { %940 = vrot.lane.b32.xlu0 %v3879_v24, %s3208_s11  ;;  %v1570_v4 = vpop.permute.xlu1 %1569 }
 0x1ea   : > { %1650 = vst.msk [vmem:[#allocation3 + $0x170] sm:$0xff] %vm992_vm4, %v1570_v4  ;;  %v4408_v4 = vld [vmem:[#allocation2 + $0x180] sm:$0xff] }
 0x1eb   : > { %v929_v11 = vpop.permute.xlu0 %928 }
 0x1ec   : > { %942 = vrot.lane.b32.xlu1 %v3889_v29, %s3208_s11  ;;  %1009 = vst.msk [vmem:[#allocation3 + $0x180] sm:$0xff] %vm992_vm4, %v929_v11 }
 0x1ed   : > { %1776 = vrot.lane.b32.xlu0 %v3960_v32, %s3209_s12  ;;  %v1313_v47 = vpop.permute.xlu1 %1312 }
 0x1ef   : > { %v1753_v17 = vpop.permute.xlu0 %1752 }
 0x1f0   : > { %1778 = vrot.lane.b32.xlu1 %v3962_v55, %s3209_s12  ;;  %1838 = vst.msk [vmem:[#allocation3 + $0xf8] sm:$0xff] %vm1185_vm5, %v1753_v17 }
 0x1f1   : > { %1133 = vrot.lane.b32.xlu0 %v3859_v62, %s3209_s12  ;;  %v931_v24 = vpop.permute.xlu1 %930 }
 0x1f2   : > { %1010 = vst.msk [vmem:[#allocation3 + $0x198] sm:$0xff] %vm992_vm4, %v931_v24  ;;  %v4413_v24 = vld [vmem:[#allocation2 + $0x188] sm:$0xff] }
 0x1f3   : > { %v1945_v25 = vpop.permute.xlu0 %1944 }
 0x1f4   : > { %1135 = vrot.lane.b32.xlu1 %v3861_v19, %s3209_s12  ;;  %2030 = vst.msk [vmem:[#allocation3 + $0xf8] sm:$0xff] %vm1378_vm6, %v1945_v25 }
 0x1f5   : > { %1968 = vrot.lane.b32.xlu0 %v3964_v37, %s3210_s15  ;;  %v1124_v29 = vpop.permute.xlu1 %1123 }
 0x1f6   : > { %1203 = vst.msk [vmem:[#allocation3 + $0x198] sm:$0xff] %vm1185_vm5, %v1124_v29 }
 0x1f7   : > { %v1307_v58 = vpop.permute.xlu0 %1306 }
 0x1f8   : > { %1970 = vrot.lane.b32.xlu1 %v3967_v61, %s3210_s15  ;;  %1391 = vst.msk [vmem:[#allocation3 + $0x120] sm:$0xff] %vm1378_vm6, %v1307_v58 }
 0x1f9   : > { %1326 = vrot.lane.b32.xlu0 %v4224_v26, %s3210_s15  ;;  %v1755_v62 = vpop.permute.xlu1 %1754 }
 0x1fa   : > { %1839 = vst.msk [vmem:[#allocation3 + $0x110] sm:$0xff] %vm1185_vm5, %v1755_v62 }
 0x1fb   : > { %v925_v19 = vpop.permute.xlu0 %924  ;;  %v2147_v56 = vld [vmem:[#allocation3 + $0xf8] sm:$0xff] }
 0x1fc   : > { %1328 = vrot.lane.b32.xlu1 %v4229_v34, %s3210_s15  ;;  %1007 = vst.msk [vmem:[#allocation3 + $0x150] sm:$0xff] %vm992_vm4, %v925_v19  ;;  %v2082_v19 = vld [vmem:[#allocation2 + $0x19a] sm:$0xff] }
 0x1fd   : > { %1587 = vrot.lane.b32.xlu0 %v3942_v7, %s3208_s11  ;;  %2114 = vst.msk [vmem:[#allocation3 + $0x2e0] sm:$0xff] %vm679_vm2, %v2082_v19 }
 0x1fe   : > { %v1947_v0 = vpop.permute.xlu1 %1946 }
 0x1ff   : > { %2031 = vst.msk [vmem:[#allocation3 + $0x110] sm:$0xff] %vm1378_vm6, %v1947_v0  ;;  %v1568_v50 = vpop.permute.xlu0 %1567  ;;  %v2083_v0 = vld [vmem:[#allocation2 + $0x1a2] sm:$0xff] }
 0x200   : > { %1589 = vrot.lane.b32.xlu1 %v3944_v53, %s3208_s11  ;;  %1649 = vst.msk [vmem:[#allocation3 + $0x158] sm:$0xff] %vm992_vm4, %v1568_v50 }
 0x201   : > { %944 = vrot.lane.b32.xlu0 %v3873_v41, %s3208_s11  ;;  %2115 = vst.msk [vmem:[#allocation3 + $0x2f8] sm:$0xff] %vm679_vm2, %v2083_v0 }
 0x202   : > { %v1566_v26 = vpop.permute.xlu1 %1565 }
 0x203   : > { %1648 = vst.msk [vmem:[#allocation3 + $0x140] sm:$0xff] %vm992_vm4, %v1566_v26  ;;  %v1122_v34 = vpop.permute.xlu0 %1121 }
 0x204   : > { %1841 = vst.msk [vmem:[#allocation3 + $0x140] sm:$0xff] %vm1185_vm5, %v1759_v3  ;;  %946 = vrot.lane.b32.xlu1 %v3875_v20, %s3208_s11  ;;  %1202 = vst.msk [vmem:[#allocation3 + $0x180] sm:$0xff] %vm1185_vm5, %v1122_v34  ;;  %v2227_v20 = vpack.c.bf16 %v2149_v51, %v2146_v8 }
 0x205   : > { %2033 = vst.msk [vmem:[#allocation3 + $0x140] sm:$0xff] %vm1378_vm6, %v1951_v33  ;;  %1780 = vrot.lane.b32.xlu0 %v3969_v39, %s3209_s12 }
 0x206   : > { %v1309_v54 = vpop.permute.xlu1 %1308  ;;  %v2150_v41 = vld [vmem:[#allocation3 + $0x110] sm:$0xff] }
 0x207   : > { %1392 = vst.msk [vmem:[#allocation3 + $0x138] sm:$0xff] %vm1378_vm6, %v1309_v54  ;;  %v2228_v9 = vpack.c.bf16 %v2150_v41, %v2147_v56  ;;  %v1564_v31 = vpop.permute.xlu0 %1563  ;;  %v2208_v41 = vld [vmem:[#allocation3 + $0x2e0] sm:$0xff] }
 0x208   : > { %1782 = vrot.lane.b32.xlu1 %v3971_v40, %s3209_s12  ;;  %1647 = vst.msk [vmem:[#allocation3 + $0x128] sm:$0xff] %vm992_vm4, %v1564_v31 }
 0x209   : > { %2524 = vmatprep.mubr.bf16.mxu1 %v2228_v9  ;;  %1840 = vst.msk [vmem:[#allocation3 + $0x128] sm:$0xff] %vm1185_vm5, %v4266_v48  ;;  %1137 = vrot.lane.b32.xlu0 %v3849_v13, %s3209_s12  ;;  %v2152_v48 = vld [vmem:[#allocation3 + $0x120] sm:$0xff]  ;;  %v2211_v9 = vld [vmem:[#allocation3 + $0x2f8] sm:$0xff] }
 0x20a   : > { %v927_v14 = vpop.permute.xlu1 %926  ;;  %2525 = vmatmul.mubr.bf16.gmra.mxu1 %v2227_v20  ;;  %2032 = vst.msk [vmem:[#allocation3 + $0x128] sm:$0xff] %vm1378_vm6, %v4272_v12  ;;  %v2259_v20 = vpack.c.bf16 %v2211_v9, %v2208_v41 }
 0x20b   : > { %1008 = vst.msk [vmem:[#allocation3 + $0x168] sm:$0xff] %vm992_vm4, %v927_v14  ;;  %v1118_v49 = vpop.permute.xlu0 %1117 }
 0x20c   : > { %1139 = vrot.lane.b32.xlu1 %v3851_v35, %s3209_s12  ;;  %1200 = vst.msk [vmem:[#allocation3 + $0x150] sm:$0xff] %vm1185_vm5, %v1118_v49  ;;  %v2156_v59 = vld [vmem:[#allocation3 + $0x140] sm:$0xff]  ;;  %3147 = vmatmul.mubr.msk.bf16.gmra.mxu0 %vm679_vm2, %v2259_v20  ;;  %v1698_v49 = vld [vmem:[#allocation2 + $0x198] sm:$0xff] }
 0x20d   : > { %1393 = vst.msk [vmem:[#allocation3 + $0x150] sm:$0xff] %vm1378_vm6, %v4278_v15  ;;  %1972 = vrot.lane.b32.xlu0 %v3980_v60, %s3210_s15 }
 0x20e   : > { %v1120_v13 = vpop.permute.xlu1 %1119  ;;  %v2155_v28 = vld [vmem:[#allocation3 + $0x138] sm:$0xff] }
 0x20f   : > { %1201 = vst.msk [vmem:[#allocation3 + $0x168] sm:$0xff] %vm1185_vm5, %v1120_v13  ;;  %v4347_v27 = vpop.permute.xlu0 %1764  ;;  %v2230_v3 = vpack.c.bf16 %v2155_v28, %v2152_v48 }
 0x210   : > { %1394 = vst.msk [vmem:[#allocation3 + $0x168] sm:$0xff] %vm1378_vm6, %v1313_v47  ;;  %1974 = vrot.lane.b32.xlu1 %v3988_v43, %s3210_s15 }
 0x211   : > { %1330 = vrot.lane.b32.xlu0 %v3960_v32, %s3210_s15  ;;  %v2153_v63 = vld [vmem:[#allocation3 + $0x128] sm:$0xff] }
 0x212   : > { %v1767_v35 = vpop.permute.xlu1 %1766  ;;  %v2231_v30 = vpack.c.bf16 %v2156_v59, %v2153_v63 }
 0x213   : > { %v4353_v42 = vpop.permute.xlu0 %1956 }
 0x214   : > { %1332 = vrot.lane.b32.xlu1 %v3962_v55, %s3210_s15  ;;  %2532 = vmatprep.mubr.bf16.mxu1 %v2231_v30  ;;  %v2158_v29 = vld [vmem:[#allocation3 + $0x150] sm:$0xff] }
 0x215   : > { %1591 = vrot.lane.b32.xlu0 %v3931_v6, %s3208_s11  ;;  %2533 = vmatmul.mubr.bf16.gmra.mxu1 %v2230_v3  ;;  %v1890_v30 = vld [vmem:[#allocation2 + $0x199] sm:$0xff]  ;;  %v1891_v3 = vld [vmem:[#allocation2 + $0x1a1] sm:$0xff] }
 0x216   : > { %v1959_v21 = vpop.permute.xlu1 %1958 }
 0x217   : > { %v4359_v1 = vpop.permute.xlu0 %1318  ;;  %v2161_v11 = vld [vmem:[#allocation3 + $0x168] sm:$0xff] }
 0x218   : > { %1593 = vrot.lane.b32.xlu1 %v3933_v36, %s3208_s11  ;;  %v2233_v58 = vpack.c.bf16 %v2161_v11, %v2158_v29 }
 0x219   : > { %948 = vrot.lane.b32.xlu0 %v3964_v37, %s3208_s11 }
 0x21a   : > { %v1578_v32 = vpop.permute.xlu1 %1577 }
 0x21b   : > { %1654 = vst.msk [vmem:[#allocation3 + $0x1d0] sm:$0xff] %vm992_vm4, %v1578_v32  ;;  %v937_v52 = vpop.permute.xlu0 %936 }
 0x21c   : > { %950 = vrot.lane.b32.xlu1 %v3967_v61, %s3208_s11  ;;  %1013 = vst.msk [vmem:[#allocation3 + $0x1e0] sm:$0xff] %vm992_vm4, %v937_v52 }
 0x21d   : > { %1784 = vrot.lane.b32.xlu0 %v4101_v18, %s3209_s12 }
 0x21e   : > { %v4371_v55 = vpop.permute.xlu1 %1320 }
 0x21f   : > { %v1761_v23 = vpop.permute.xlu0 %1760 }
 0x220   : > { %1786 = vrot.lane.b32.xlu1 %v4103_v44, %s3209_s12  ;;  %1842 = vst.msk [vmem:[#allocation3 + $0x158] sm:$0xff] %vm1185_vm5, %v1761_v23 }
 0x221   : > { %1141 = vrot.lane.b32.xlu0 %v3942_v7, %s3209_s12 }
 0x222   : > { %v939_v37 = vpop.permute.xlu1 %938 }
 0x223   : > { %1014 = vst.msk [vmem:[#allocation3 + $0x1f8] sm:$0xff] %vm992_vm4, %v939_v37  ;;  %v1953_v61 = vpop.permute.xlu0 %1952 }
 0x224   : > { %1143 = vrot.lane.b32.xlu1 %v3944_v53, %s3209_s12  ;;  %2034 = vst.msk [vmem:[#allocation3 + $0x158] sm:$0xff] %vm1378_vm6, %v1953_v61 }
 0x225   : > { %1976 = vrot.lane.b32.xlu0 %v4106_v16, %s3210_s15 }
 0x226   : > { %v1132_v12 = vpop.permute.xlu1 %1131 }
 0x227   : > { %1207 = vst.msk [vmem:[#allocation3 + $0x1f8] sm:$0xff] %vm1185_vm5, %v1132_v12  ;;  %v1315_v57 = vpop.permute.xlu0 %1314 }
 0x228   : > { %1978 = vrot.lane.b32.xlu1 %v4108_v46, %s3210_s15  ;;  %1395 = vst.msk [vmem:[#allocation3 + $0x180] sm:$0xff] %vm1378_vm6, %v1315_v57 }
 0x229   : > { %1334 = vrot.lane.b32.xlu0 %v3969_v39, %s3210_s15 }
 0x22a   : > { %v1763_v7 = vpop.permute.xlu1 %1762 }
 0x22b   : > { %1843 = vst.msk [vmem:[#allocation3 + $0x170] sm:$0xff] %vm1185_vm5, %v1763_v7  ;;  %v933_v53 = vpop.permute.xlu0 %932  ;;  %v2159_v47 = vld [vmem:[#allocation3 + $0x158] sm:$0xff] }
 0x22c   : > { %1336 = vrot.lane.b32.xlu1 %v3971_v40, %s3210_s15  ;;  %1011 = vst.msk [vmem:[#allocation3 + $0x1b0] sm:$0xff] %vm992_vm4, %v933_v53 }
 0x22d   : > { %1595 = vrot.lane.b32.xlu0 %v4080_v5, %s3208_s11 }
 0x22e   : > { %v1955_v33 = vpop.permute.xlu1 %1954 }
 0x22f   : > { %2035 = vst.msk [vmem:[#allocation3 + $0x170] sm:$0xff] %vm1378_vm6, %v1955_v33  ;;  %v1576_v15 = vpop.permute.xlu0 %1575 }
 0x230   : > { %1597 = vrot.lane.b32.xlu1 %v4082_v38, %s3208_s11  ;;  %1653 = vst.msk [vmem:[#allocation3 + $0x1b8] sm:$0xff] %vm992_vm4, %v1576_v15 }
 0x231   : > { %952 = vrot.lane.b32.xlu0 %v3980_v60, %s3208_s11 }
 0x232   : > { %v1574_v39 = vpop.permute.xlu1 %1573 }
 0x233   : > { %1652 = vst.msk [vmem:[#allocation3 + $0x1a0] sm:$0xff] %vm992_vm4, %v1574_v39  ;;  %v1130_v40 = vpop.permute.xlu0 %1129 }
 0x234   : > { %1845 = vst.msk [vmem:[#allocation3 + $0x1a0] sm:$0xff] %vm1185_vm5, %v1767_v35  ;;  %954 = vrot.lane.b32.xlu1 %v3988_v43, %s3208_s11  ;;  %1206 = vst.msk [vmem:[#allocation3 + $0x1e0] sm:$0xff] %vm1185_vm5, %v1130_v40 }
 0x235   : > { %2037 = vst.msk [vmem:[#allocation3 + $0x1a0] sm:$0xff] %vm1378_vm6, %v1959_v21  ;;  %1788 = vrot.lane.b32.xlu0 %v4408_v4, %s3209_s12 }
 0x236   : > { %v1317_v60 = vpop.permute.xlu1 %1316  ;;  %v2162_v17 = vld [vmem:[#allocation3 + $0x170] sm:$0xff] }
 0x237   : > { %1396 = vst.msk [vmem:[#allocation3 + $0x198] sm:$0xff] %vm1378_vm6, %v1317_v60  ;;  %v2234_v25 = vpack.c.bf16 %v2162_v17, %v2159_v47  ;;  %v1572_v43 = vpop.permute.xlu0 %1571 }
 0x238   : > { %1790 = vrot.lane.b32.xlu1 %v4413_v24, %s3209_s12  ;;  %1651 = vst.msk [vmem:[#allocation3 + $0x188] sm:$0xff] %vm992_vm4, %v1572_v43 }
 0x239   : > { %2540 = vmatprep.mubr.bf16.mxu1 %v2234_v25  ;;  %1844 = vst.msk [vmem:[#allocation3 + $0x188] sm:$0xff] %vm1185_vm5, %v4347_v27  ;;  %1145 = vrot.lane.b32.xlu0 %v3931_v6, %s3209_s12  ;;  %v1699_v27 = vld [vmem:[#allocation2 + $0x1a0] sm:$0xff] }
 0x23a   : > { %v935_v62 = vpop.permute.xlu1 %934  ;;  %2541 = vmatmul.mubr.bf16.gmra.mxu1 %v2233_v58  ;;  %2036 = vst.msk [vmem:[#allocation3 + $0x188] sm:$0xff] %vm1378_vm6, %v4353_v42 }
 0x23b   : > { %1012 = vst.msk [vmem:[#allocation3 + $0x1c8] sm:$0xff] %vm992_vm4, %v935_v62  ;;  %v1126_v50 = vpop.permute.xlu0 %1125 }
 0x23c   : > { %1147 = vrot.lane.b32.xlu1 %v3933_v36, %s3209_s12  ;;  %1204 = vst.msk [vmem:[#allocation3 + $0x1b0] sm:$0xff] %vm1185_vm5, %v1126_v50  ;;  %v2168_v54 = vld [vmem:[#allocation3 + $0x1a0] sm:$0xff] }
 0x23d   : > { %1397 = vst.msk [vmem:[#allocation3 + $0x1b0] sm:$0xff] %vm1378_vm6, %v4359_v1  ;;  %1980 = vrot.lane.b32.xlu0 %v4121_v22, %s3210_s15  ;;  %v2164_v22 = vld [vmem:[#allocation3 + $0x180] sm:$0xff] }
 0x23e   : > { %v1128_v6 = vpop.permute.xlu1 %1127  ;;  %v2167_v36 = vld [vmem:[#allocation3 + $0x198] sm:$0xff] }
 0x23f   : > { %1205 = vst.msk [vmem:[#allocation3 + $0x1c8] sm:$0xff] %vm1185_vm5, %v1128_v6  ;;  %v4437_v26 = vpop.permute.xlu0 %1772  ;;  %v2236_v31 = vpack.c.bf16 %v2167_v36, %v2164_v22 }
 0x240   : > { %1398 = vst.msk [vmem:[#allocation3 + $0x1c8] sm:$0xff] %vm1378_vm6, %v4371_v55  ;;  %1982 = vrot.lane.b32.xlu1 %v4123_v45, %s3210_s15 }
 0x241   : > { %1338 = vrot.lane.b32.xlu0 %v4101_v18, %s3210_s15  ;;  %v2165_v51 = vld [vmem:[#allocation3 + $0x188] sm:$0xff] }
 0x242   : > { %v1775_v34 = vpop.permute.xlu1 %1774  ;;  %v2237_v56 = vpack.c.bf16 %v2168_v54, %v2165_v51 }
 0x243   : > { %v4443_v8 = vpop.permute.xlu0 %1964 }
 0x244   : > { %1340 = vrot.lane.b32.xlu1 %v4103_v44, %s3210_s15  ;;  %2548 = vmatprep.mubr.bf16.mxu1 %v2237_v56  ;;  %v2170_v7 = vld [vmem:[#allocation3 + $0x1b0] sm:$0xff] }
 0x245   : > { %1599 = vrot.lane.b32.xlu0 %v4070_v10, %s3208_s11  ;;  %2549 = vmatmul.mubr.bf16.gmra.mxu1 %v2236_v31 }
 0x246   : > { %v1967_v45 = vpop.permute.xlu1 %1966 }
 0x247   : > { %v1769_v18 = vpop.permute.xlu0 %1768  ;;  %v2173_v23 = vld [vmem:[#allocation3 + $0x1c8] sm:$0xff] }
 0x248   : > { %1601 = vrot.lane.b32.xlu1 %v4072_v2, %s3208_s11  ;;  %1846 = vst.msk [vmem:[#allocation3 + $0x1b8] sm:$0xff] %vm1185_vm5, %v1769_v18  ;;  %v2239_v33 = vpack.c.bf16 %v2173_v23, %v2170_v7 }
 0x249   : > { %956 = vrot.lane.b32.xlu0 %v4106_v16, %s3208_s11 }
 0x24a   : > { %v2964_v44 = vpop.f32.mrf.mxu0  ;;  %v1586_v14 = vpop.permute.xlu1 %1585 }
 0x24b   : > { %1658 = vst.msk [vmem:[#allocation3 + $0x230] sm:$0xff] %vm992_vm4, %v1586_v14  ;;  %v1961_v13 = vpop.permute.xlu0 %1960 }
 0x24c   : > { %v2965_v10 = vpop.f32.mrf.mxu0  ;;  %958 = vrot.lane.b32.xlu1 %v4108_v46, %s3208_s11  ;;  %2038 = vst.msk [vmem:[#allocation3 + $0x1b8] sm:$0xff] %vm1378_vm6, %v1961_v13 }
 0x24d   : > { %1792 = vrot.lane.b32.xlu0 %v1698_v49, %s3209_s12  ;;  %v2966_v59 = vadd.f32 %v2965_v10, %v2964_v44 }
 0x24e   : > { %v2967_v2 = vpop.f32.mrf.mxu0  ;;  %v1771_v28 = vpop.permute.xlu1 %1770 }
 0x24f   : > { %1847 = vst.msk [vmem:[#allocation3 + $0x1d0] sm:$0xff] %vm1185_vm5, %v1771_v28  ;;  %v1323_v16 = vpop.permute.xlu0 %1322 }
 0x250   : > { %v2968_v35 = vpop.f32.mrf.mxu0  ;;  %1794 = vrot.lane.b32.xlu1 %v1699_v27, %s3209_s12  ;;  %1399 = vst.msk [vmem:[#allocation3 + $0x1e0] sm:$0xff] %vm1378_vm6, %v1323_v16 }
 0x251   : > { %1149 = vrot.lane.b32.xlu0 %v4080_v5, %s3209_s12  ;;  %v2969_v32 = vadd.f32 %v2968_v35, %v2967_v2 }
 0x252   : > { %v4465_v46 = vpop.f32.mrf.mxu0  ;;  %v1963_v63 = vpop.permute.xlu1 %1962 }
 0x253   : > { %2039 = vst.msk [vmem:[#allocation3 + $0x1d0] sm:$0xff] %vm1378_vm6, %v1963_v63  ;;  %v1584_v48 = vpop.permute.xlu0 %1583  ;;  %v2171_v61 = vld [vmem:[#allocation3 + $0x1b8] sm:$0xff] }
 0x254   : > { %v2647_v42 = vpop.f32.mrf.mxu0  ;;  %1151 = vrot.lane.b32.xlu1 %v4082_v38, %s3209_s12  ;;  %1657 = vst.msk [vmem:[#allocation3 + $0x218] sm:$0xff] %vm992_vm4, %v1584_v48 }
 0x255   : > { %v2648_v5 = vadd.f32 %v2966_v59, %v2647_v42  ;;  %1984 = vrot.lane.b32.xlu0 %v1890_v30, %s3210_s15 }
 0x256   : > { %v4479_v21 = vpop.f32.mrf.mxu0  ;;  %v1582_v1 = vpop.permute.xlu1 %1581 }
 0x257   : > { %2775 = vst.msk [vmem:[%s4473_s17] sm:$0xff] %vm2774_vm7, %v2648_v5  ;;  %v1580_v52 = vpop.permute.xlu0 %1579  ;;  %v2176_v40 = vld [vmem:[#allocation3 + $0x1e0] sm:$0xff] }
 0x258   : > { %1656 = vst.msk [vmem:[#allocation3 + $0x200] sm:$0xff] %vm992_vm4, %v1582_v1  ;;  %v2650_v55 = vpop.f32.mrf.mxu0  ;;  %1986 = vrot.lane.b32.xlu1 %v1891_v3, %s3210_s15  ;;  %1655 = vst.msk [vmem:[#allocation3 + $0x1e8] sm:$0xff] %vm992_vm4, %v1580_v52 }
 0x259   : > { %1849 = vst.msk [vmem:[#allocation3 + $0x200] sm:$0xff] %vm1185_vm5, %v1775_v34  ;;  %v2651_v38 = vadd.f32 %v2969_v32, %v2650_v55  ;;  %1848 = vst.msk [vmem:[#allocation3 + $0x1e8] sm:$0xff] %vm1185_vm5, %v4437_v26  ;;  %1342 = vrot.lane.b32.xlu0 %v4408_v4, %s3210_s15 }
 0x25a   : > { %2041 = vst.msk [vmem:[#allocation3 + $0x200] sm:$0xff] %vm1378_vm6, %v1967_v45  ;;  %v1325_v37 = vpop.permute.xlu1 %1324  ;;  %v2174_v12 = vld [vmem:[#allocation3 + $0x1d0] sm:$0xff]  ;;  %2040 = vst.msk [vmem:[#allocation3 + $0x1e8] sm:$0xff] %vm1378_vm6, %v4443_v8  ;;  %v4510_v51 = vpop.f32.mrf.mxu0 }
 0x25b   : > { %2776 = vst.msk [vmem:[%s4473_s17 + $0x8] sm:$0xff] %vm2774_vm7, %v2651_v38  ;;  %v2240_v57 = vpack.c.bf16 %v2174_v12, %v2171_v61  ;;  %v941_v53 = vpop.permute.xlu0 %940 }
 0x25c   : > { %1400 = vst.msk [vmem:[#allocation3 + $0x1f8] sm:$0xff] %vm1378_vm6, %v1325_v37  ;;  %1344 = vrot.lane.b32.xlu1 %v4413_v24, %s3210_s15  ;;  %v2663_v45 = vpop.f32.mrf.mxu0 }
 0x25d   : > { %1015 = vst.msk [vmem:[#allocation3 + $0x210] sm:$0xff] %vm992_vm4, %v941_v53  ;;  %2556 = vmatprep.mubr.bf16.mxu1 %v2240_v57 }
 0x25e   : > { %v943_v15 = vpop.permute.xlu1 %942  ;;  %2557 = vmatmul.mubr.bf16.gmra.mxu1 %v2239_v33  ;;  %v4521_v2 = vpop.f32.mrf.mxu0 }
 0x25f   : > { %1016 = vst.msk [vmem:[#allocation3 + $0x228] sm:$0xff] %vm992_vm4, %v943_v15  ;;  %v1777_v39 = vpop.permute.xlu0 %1776 }
 0x260   : > { %1850 = vst.msk [vmem:[#allocation3 + $0x218] sm:$0xff] %vm1185_vm5, %v1777_v39  ;;  %v2666_v48 = vpop.f32.mrf.mxu0 }
 0x261   : > { %v2177_v11 = vld [vmem:[#allocation3 + $0x1e8] sm:$0xff]  ;;  %v2180_v60 = vld [vmem:[#allocation3 + $0x200] sm:$0xff] }
 0x262   : > { %v1779_v4 = vpop.permute.xlu1 %1778  ;;  %v2243_v17 = vpack.c.bf16 %v2180_v60, %v2177_v11 }
 0x263   : > { %v2179_v47 = vld [vmem:[#allocation3 + $0x1f8] sm:$0xff]  ;;  %1851 = vst.msk [vmem:[#allocation3 + $0x230] sm:$0xff] %vm1185_vm5, %v1779_v4  ;;  %v1134_v25 = vpop.permute.xlu0 %1133 }
 0x264   : > { %v2242_v24 = vpack.c.bf16 %v2179_v47, %v2176_v40  ;;  %1208 = vst.msk [vmem:[#allocation3 + $0x210] sm:$0xff] %vm1185_vm5, %v1134_v25  ;;  %2564 = vmatprep.mubr.bf16.mxu1 %v2243_v17 }
 0x266   : > { %v1136_v29 = vpop.permute.xlu1 %1135  ;;  %2565 = vmatmul.mubr.bf16.gmra.mxu1 %v2242_v24 }
 0x267   : > { %1209 = vst.msk [vmem:[#allocation3 + $0x228] sm:$0xff] %vm1185_vm5, %v1136_v29  ;;  %v1969_v43 = vpop.permute.xlu0 %1968 }
 0x268   : > { %2042 = vst.msk [vmem:[#allocation3 + $0x218] sm:$0xff] %vm1378_vm6, %v1969_v43 }
 0x269   : > { %v2970_v62 = vpop.f32.mrf.mxu1 }
 0x26a   : > { %v1971_v58 = vpop.permute.xlu1 %1970 }
 0x26b   : > { %2043 = vst.msk [vmem:[#allocation3 + $0x230] sm:$0xff] %vm1378_vm6, %v1971_v58  ;;  %v1327_v19 = vpop.permute.xlu0 %1326  ;;  %v2971_v0 = vpop.f32.mrf.mxu1 }
 0x26c   : > { %1401 = vst.msk [vmem:[#allocation3 + $0x210] sm:$0xff] %vm1378_vm6, %v1327_v19  ;;  %v2972_v50 = vadd.f32 %v2971_v0, %v2970_v62  ;;  %v4548_v19 = vpop.f32.mrf.mxu0 }
 0x26d   : > { %v2973_v26 = vpop.f32.mrf.mxu1 }
 0x26e   : > { %v1329_v6 = vpop.permute.xlu1 %1328  ;;  %v2656_v36 = vadd.f32 %v4465_v46, %v2972_v50 }
 0x26f   : > { %1402 = vst.msk [vmem:[#allocation3 + $0x228] sm:$0xff] %vm1378_vm6, %v1329_v6  ;;  %v1588_v34 = vpop.permute.xlu0 %1587  ;;  %v2974_v54 = vpop.f32.mrf.mxu1  ;;  %v2183_v41 = vld [vmem:[#allocation3 + $0x218] sm:$0xff] }
 0x270   : > { %1659 = vst.msk [vmem:[#allocation3 + $0x248] sm:$0xff] %vm992_vm4, %v1588_v34  ;;  %v2975_v56 = vadd.f32 %v2974_v54, %v2973_v26  ;;  %v2679_v54 = vpop.f32.mrf.mxu0 }
 0x271   : > { %2777 = vst.msk [vmem:[%s4473_s17 + $0x10] sm:$0xff] %vm2774_vm7, %v2656_v36 }
 0x272   : > { %v1590_v22 = vpop.permute.xlu1 %1589  ;;  %v2186_v9 = vld [vmem:[#allocation3 + $0x230] sm:$0xff]  ;;  %v2659_v31 = vadd.f32 %v4479_v21, %v2975_v56 }
 0x273   : > { %1660 = vst.msk [vmem:[#allocation3 + $0x260] sm:$0xff] %vm992_vm4, %v1590_v22  ;;  %v2246_v8 = vpack.c.bf16 %v2186_v9, %v2183_v41  ;;  %v945_v20 = vpop.permute.xlu0 %944  ;;  %v2182_v14 = vld [vmem:[#allocation3 + $0x210] sm:$0xff] }
 0x274   : > { %1017 = vst.msk [vmem:[#allocation3 + $0x240] sm:$0xff] %vm992_vm4, %v945_v20 }
 0x275   : > { %2572 = vmatprep.mubr.bf16.mxu1 %v2246_v8  ;;  %2778 = vst.msk [vmem:[%s4473_s17 + $0x18] sm:$0xff] %vm2774_vm7, %v2659_v31  ;;  %v2976_v44 = vpop.f32.mrf.mxu1 }
 0x276   : > { %v947_v18 = vpop.permute.xlu1 %946  ;;  %v2185_v49 = vld [vmem:[#allocation3 + $0x228] sm:$0xff] }
 0x277   : > { %1018 = vst.msk [vmem:[#allocation3 + $0x258] sm:$0xff] %vm992_vm4, %v947_v18  ;;  %v2245_v13 = vpack.c.bf16 %v2185_v49, %v2182_v14  ;;  %v1781_v10 = vpop.permute.xlu0 %1780  ;;  %v2977_v27 = vpop.f32.mrf.mxu1 }
 0x278   : > { %1852 = vst.msk [vmem:[#allocation3 + $0x248] sm:$0xff] %vm1185_vm5, %v1781_v10  ;;  %v2978_v28 = vadd.f32 %v2977_v27, %v2976_v44 }
 0x279   : > { %2573 = vmatmul.mubr.bf16.gmra.mxu1 %v2245_v13  ;;  %v2979_v35 = vpop.f32.mrf.mxu1 }
 0x27a   : > { %v1783_v16 = vpop.permute.xlu1 %1782  ;;  %v2664_v46 = vadd.f32 %v2978_v28, %v2663_v45  ;;  %v4559_v45 = vpop.f32.mrf.mxu0 }
 0x27b   : > { %1853 = vst.msk [vmem:[#allocation3 + $0x260] sm:$0xff] %vm1185_vm5, %v1783_v16  ;;  %v1138_v63 = vpop.permute.xlu0 %1137  ;;  %v2980_v59 = vpop.f32.mrf.mxu1 }
 0x27c   : > { %2779 = vst.msk [vmem:[%s4473_s17 + $0x20] sm:$0xff] %vm2774_vm7, %v2664_v46  ;;  %v2981_v30 = vadd.f32 %v2980_v59, %v2979_v35 }
 0x27d   : > { %1210 = vst.msk [vmem:[#allocation3 + $0x240] sm:$0xff] %vm1185_vm5, %v1138_v63 }
 0x27e   : > { %v1140_v42 = vpop.permute.xlu1 %1139  ;;  %v2667_v5 = vadd.f32 %v2981_v30, %v2666_v48 }
 0x27f   : > { %1211 = vst.msk [vmem:[#allocation3 + $0x258] sm:$0xff] %vm1185_vm5, %v1140_v42  ;;  %v1973_v3 = vpop.permute.xlu0 %1972 }
 0x280   : > { %2780 = vst.msk [vmem:[%s4473_s17 + $0x28] sm:$0xff] %vm2774_vm7, %v2667_v5 }
 0x281   : > { %2044 = vst.msk [vmem:[#allocation3 + $0x248] sm:$0xff] %vm1378_vm6, %v1973_v3 }
 0x282   : > { %v1975_v21 = vpop.permute.xlu1 %1974 }
 0x283   : > { %2045 = vst.msk [vmem:[#allocation3 + $0x260] sm:$0xff] %vm1378_vm6, %v1975_v21  ;;  %v1331_v1 = vpop.permute.xlu0 %1330 }
 0x284   : > { %1403 = vst.msk [vmem:[#allocation3 + $0x240] sm:$0xff] %vm1378_vm6, %v1331_v1 }
 0x286   : > { %v1333_v32 = vpop.permute.xlu1 %1332 }
 0x287   : > { %1404 = vst.msk [vmem:[#allocation3 + $0x258] sm:$0xff] %vm1378_vm6, %v1333_v32  ;;  %v1592_v52 = vpop.permute.xlu0 %1591 }
 0x288   : > { %1661 = vst.msk [vmem:[#allocation3 + $0x278] sm:$0xff] %vm992_vm4, %v1592_v52  ;;  %v2189_v38 = vld [vmem:[#allocation3 + $0x248] sm:$0xff] }
 0x28a   : > { %v1594_v55 = vpop.permute.xlu1 %1593  ;;  %v2192_v23 = vld [vmem:[#allocation3 + $0x260] sm:$0xff] }
 0x28b   : > { %1662 = vst.msk [vmem:[#allocation3 + $0x290] sm:$0xff] %vm992_vm4, %v1594_v55  ;;  %v2249_v37 = vpack.c.bf16 %v2192_v23, %v2189_v38  ;;  %v949_v61 = vpop.permute.xlu0 %948  ;;  %v2188_v57 = vld [vmem:[#allocation3 + $0x240] sm:$0xff] }
 0x28c   : > { %1019 = vst.msk [vmem:[#allocation3 + $0x270] sm:$0xff] %vm992_vm4, %v949_v61 }
 0x28d   : > { %2580 = vmatprep.mubr.bf16.mxu1 %v2249_v37 }
 0x28e   : > { %v951_v12 = vpop.permute.xlu1 %950  ;;  %v2191_v7 = vld [vmem:[#allocation3 + $0x258] sm:$0xff] }
 0x28f   : > { %1020 = vst.msk [vmem:[#allocation3 + $0x288] sm:$0xff] %vm992_vm4, %v951_v12  ;;  %v2248_v53 = vpack.c.bf16 %v2191_v7, %v2188_v57  ;;  %v1785_v33 = vpop.permute.xlu0 %1784 }
 0x290   : > { %1854 = vst.msk [vmem:[#allocation3 + $0x278] sm:$0xff] %vm1185_vm5, %v1785_v33 }
 0x291   : > { %2581 = vmatmul.mubr.bf16.gmra.mxu1 %v2248_v53 }
 0x292   : > { %v1787_v15 = vpop.permute.xlu1 %1786 }
 0x293   : > { %1855 = vst.msk [vmem:[#allocation3 + $0x290] sm:$0xff] %vm1185_vm5, %v1787_v15  ;;  %v1142_v39 = vpop.permute.xlu0 %1141 }
 0x294   : > { %1212 = vst.msk [vmem:[#allocation3 + $0x270] sm:$0xff] %vm1185_vm5, %v1142_v39 }
 0x296   : > { %v1144_v40 = vpop.permute.xlu1 %1143 }
 0x297   : > { %1213 = vst.msk [vmem:[#allocation3 + $0x288] sm:$0xff] %vm1185_vm5, %v1144_v40  ;;  %v1977_v4 = vpop.permute.xlu0 %1976 }
 0x298   : > { %2046 = vst.msk [vmem:[#allocation3 + $0x278] sm:$0xff] %vm1378_vm6, %v1977_v4 }
 0x299   : > { %v2982_v60 = vpop.f32.mrf.mxu1 }
 0x29a   : > { %v1979_v11 = vpop.permute.xlu1 %1978 }
 0x29b   : > { %2047 = vst.msk [vmem:[#allocation3 + $0x290] sm:$0xff] %vm1378_vm6, %v1979_v11  ;;  %v1335_v47 = vpop.permute.xlu0 %1334  ;;  %v2983_v17 = vpop.f32.mrf.mxu1 }
 0x29c   : > { %1405 = vst.msk [vmem:[#allocation3 + $0x270] sm:$0xff] %vm1378_vm6, %v1335_v47  ;;  %v2984_v24 = vadd.f32 %v2983_v17, %v2982_v60 }
 0x29d   : > { %v2985_v29 = vpop.f32.mrf.mxu1 }
 0x29e   : > { %v1337_v25 = vpop.permute.xlu1 %1336  ;;  %v2672_v43 = vadd.f32 %v4510_v51, %v2984_v24 }
 0x29f   : > { %1406 = vst.msk [vmem:[#allocation3 + $0x288] sm:$0xff] %vm1378_vm6, %v1337_v25  ;;  %v1596_v58 = vpop.permute.xlu0 %1595  ;;  %v2986_v62 = vpop.f32.mrf.mxu1  ;;  %v2195_v6 = vld [vmem:[#allocation3 + $0x278] sm:$0xff] }
 0x2a0   : > { %2781 = vst.msk [vmem:[%s4473_s17 + $0x30] sm:$0xff] %vm2774_vm7, %v2672_v43  ;;  %v2987_v0 = vadd.f32 %v2986_v62, %v2985_v29 }
 0x2a1   : > { %1663 = vst.msk [vmem:[#allocation3 + $0x2a8] sm:$0xff] %vm992_vm4, %v1596_v58 }
 0x2a2   : > { %v1598_v50 = vpop.permute.xlu1 %1597  ;;  %v2198_v26 = vld [vmem:[#allocation3 + $0x290] sm:$0xff]  ;;  %v2675_v36 = vadd.f32 %v4521_v2, %v2987_v0  ;;  %v2682_v2 = vpop.f32.mrf.mxu0 }
 0x2a3   : > { %1664 = vst.msk [vmem:[#allocation3 + $0x2c0] sm:$0xff] %vm992_vm4, %v1598_v50  ;;  %v2252_v34 = vpack.c.bf16 %v2198_v26, %v2195_v6  ;;  %v953_v51 = vpop.permute.xlu0 %952  ;;  %v2194_v41 = vld [vmem:[#allocation3 + $0x270] sm:$0xff] }
 0x2a4   : > { %2782 = vst.msk [vmem:[%s4473_s17 + $0x38] sm:$0xff] %vm2774_vm7, %v2675_v36  ;;  %v3132_v17 = vpop.f32.mrf.mxu0 }
 0x2a5   : > { %1021 = vst.msk [vmem:[#allocation3 + $0x2a0] sm:$0xff] %vm992_vm4, %v953_v51  ;;  %2588 = vmatprep.mubr.bf16.mxu1 %v2252_v34  ;;  %v2988_v22 = vpop.f32.mrf.mxu1 }
 0x2a6   : > { %v955_v56 = vpop.permute.xlu1 %954  ;;  %v2197_v9 = vld [vmem:[#allocation3 + $0x288] sm:$0xff]  ;;  %v2695_v43 = vpop.f32.mrf.mxu0 }
 0x2a7   : > { %1022 = vst.msk [vmem:[#allocation3 + $0x2b8] sm:$0xff] %vm992_vm4, %v955_v56  ;;  %v2251_v8 = vpack.c.bf16 %v2197_v9, %v2194_v41  ;;  %v1789_v31 = vpop.permute.xlu0 %1788  ;;  %v2989_v20 = vpop.f32.mrf.mxu1 }
 0x2a8   : > { %1856 = vst.msk [vmem:[#allocation3 + $0x2a8] sm:$0xff] %vm1185_vm5, %v1789_v31  ;;  %v2990_v18 = vadd.f32 %v2989_v20, %v2988_v22  ;;  %v3133_v26 = vpop.f32.mrf.mxu0 }
 0x2a9   : > { %2589 = vmatmul.mubr.bf16.gmra.mxu1 %v2251_v8  ;;  %v2991_v14 = vpop.f32.mrf.mxu1 }
 0x2aa   : > { %v1791_v44 = vpop.permute.xlu1 %1790  ;;  %v2680_v49 = vadd.f32 %v2990_v18, %v2679_v54  ;;  %v2698_v56 = vpop.f32.mrf.mxu0 }
 0x2ab   : > { %1857 = vst.msk [vmem:[#allocation3 + $0x2c0] sm:$0xff] %vm1185_vm5, %v1791_v44  ;;  %v1146_v13 = vpop.permute.xlu0 %1145  ;;  %v2992_v10 = vpop.f32.mrf.mxu1 }
 0x2ac   : > { %2783 = vst.msk [vmem:[%s4473_s17 + $0x40] sm:$0xff] %vm2774_vm7, %v2680_v49  ;;  %v2993_v27 = vadd.f32 %v2992_v10, %v2991_v14  ;;  %v3136_v44 = vpop.f32.mrf.mxu0 }
 0x2ad   : > { %1214 = vst.msk [vmem:[#allocation3 + $0x2a0] sm:$0xff] %vm1185_vm5, %v1146_v13 }
 0x2ae   : > { %v1148_v28 = vpop.permute.xlu1 %1147  ;;  %v2683_v16 = vadd.f32 %v2993_v27, %v2682_v2  ;;  %v2711_v49 = vpop.f32.mrf.mxu0 }
 0x2af   : > { %1215 = vst.msk [vmem:[#allocation3 + $0x2b8] sm:$0xff] %vm1185_vm5, %v1148_v28  ;;  %v1981_v35 = vpop.permute.xlu0 %1980 }
 0x2b0   : > { %2784 = vst.msk [vmem:[%s4473_s17 + $0x48] sm:$0xff] %vm2774_vm7, %v2683_v16  ;;  %v3137_v2 = vpop.f32.mrf.mxu0 }
 0x2b1   : > { %2048 = vst.msk [vmem:[#allocation3 + $0x2a8] sm:$0xff] %vm1378_vm6, %v1981_v35 }
 0x2b2   : > { %v1983_v46 = vpop.permute.xlu1 %1982 }
 0x2b3   : > { %2049 = vst.msk [vmem:[#allocation3 + $0x2c0] sm:$0xff] %vm1378_vm6, %v1983_v46  ;;  %v1339_v63 = vpop.permute.xlu0 %1338 }
 0x2b4   : > { %1407 = vst.msk [vmem:[#allocation3 + $0x2a0] sm:$0xff] %vm1378_vm6, %v1339_v63  ;;  %v2714_v63 = vpop.f32.mrf.mxu0 }
 0x2b6   : > { %v1341_v59 = vpop.permute.xlu1 %1340 }
 0x2b7   : > { %1408 = vst.msk [vmem:[#allocation3 + $0x2b8] sm:$0xff] %vm1378_vm6, %v1341_v59  ;;  %v1600_v30 = vpop.permute.xlu0 %1599 }
 0x2b8   : > { %1665 = vst.msk [vmem:[#allocation3 + $0x2d8] sm:$0xff] %vm992_vm4, %v1600_v30  ;;  %v2201_v42 = vld [vmem:[#allocation3 + $0x2a8] sm:$0xff] }
 0x2ba   : > { %v1602_v48 = vpop.permute.xlu1 %1601  ;;  %v2204_v5 = vld [vmem:[#allocation3 + $0x2c0] sm:$0xff] }
 0x2bb   : > { %1666 = vst.msk [vmem:[#allocation3 + $0x2f0] sm:$0xff] %vm992_vm4, %v1602_v48  ;;  %v2255_v3 = vpack.c.bf16 %v2204_v5, %v2201_v42  ;;  %v957_v21 = vpop.permute.xlu0 %956  ;;  %v2200_v32 = vld [vmem:[#allocation3 + $0x2a0] sm:$0xff]  ;;  %v3140_v5 = vpop.f32.mrf.mxu0 }
 0x2bc   : > { %1023 = vst.msk [vmem:[#allocation3 + $0x2d0] sm:$0xff] %vm992_vm4, %v957_v21 }
 0x2bd   : > { %2596 = vmatprep.mubr.bf16.mxu1 %v2255_v3 }
 0x2be   : > { %v959_v1 = vpop.permute.xlu1 %958  ;;  %v2203_v52 = vld [vmem:[#allocation3 + $0x2b8] sm:$0xff] }
 0x2bf   : > { %1024 = vst.msk [vmem:[#allocation3 + $0x2e8] sm:$0xff] %vm992_vm4, %v959_v1  ;;  %v2254_v55 = vpack.c.bf16 %v2203_v52, %v2200_v32  ;;  %v1793_v38 = vpop.permute.xlu0 %1792  ;;  %v2727_v52 = vpop.f32.mrf.mxu0 }
 0x2c0   : > { %1858 = vst.msk [vmem:[#allocation3 + $0x2d8] sm:$0xff] %vm1185_vm5, %v1793_v38 }
 0x2c1   : > { %2597 = vmatmul.mubr.bf16.gmra.mxu1 %v2254_v55 }
 0x2c2   : > { %v1795_v23 = vpop.permute.xlu1 %1794 }
 0x2c3   : > { %1859 = vst.msk [vmem:[#allocation3 + $0x2f0] sm:$0xff] %vm1185_vm5, %v1795_v23  ;;  %v1150_v37 = vpop.permute.xlu0 %1149 }
 0x2c4   : > { %1216 = vst.msk [vmem:[#allocation3 + $0x2d0] sm:$0xff] %vm1185_vm5, %v1150_v37 }
 0x2c6   : > { %v1152_v61 = vpop.permute.xlu1 %1151 }
 0x2c7   : > { %1217 = vst.msk [vmem:[#allocation3 + $0x2e8] sm:$0xff] %vm1185_vm5, %v1152_v61  ;;  %v1985_v12 = vpop.permute.xlu0 %1984  ;;  %v3141_v61 = vpop.f32.mrf.mxu0 }
 0x2c8   : > { %2050 = vst.msk [vmem:[#allocation3 + $0x2d8] sm:$0xff] %vm1378_vm6, %v1985_v12 }
 0x2ca   : > { %v1987_v57 = vpop.permute.xlu1 %1986  ;;  %v2994_v7 = vpop.f32.mrf.mxu1 }
 0x2cb   : > { %2051 = vst.msk [vmem:[#allocation3 + $0x2f0] sm:$0xff] %vm1378_vm6, %v1987_v57  ;;  %v1343_v53 = vpop.permute.xlu0 %1342 }
 0x2cc   : > { %v2995_v33 = vpop.f32.mrf.mxu1  ;;  %1409 = vst.msk [vmem:[#allocation3 + $0x2d0] sm:$0xff] %vm1378_vm6, %v1343_v53 }
 0x2cd   : > { %v2996_v15 = vadd.f32 %v2995_v33, %v2994_v7  ;;  %v2730_v33 = vpop.f32.mrf.mxu0 }
 0x2ce   : > { %v1345_v39 = vpop.permute.xlu1 %1344  ;;  %v2997_v40 = vpop.f32.mrf.mxu1 }
 0x2cf   : > { %v2688_v4 = vadd.f32 %v4548_v19, %v2996_v15  ;;  %1410 = vst.msk [vmem:[#allocation3 + $0x2e8] sm:$0xff] %vm1378_vm6, %v1345_v39  ;;  %v2207_v60 = vld [vmem:[#allocation3 + $0x2d8] sm:$0xff] }
 0x2d0   : > { %v2998_v11 = vpop.f32.mrf.mxu1 }
 0x2d1   : > { %2785 = vst.msk [vmem:[%s4473_s17 + $0x50] sm:$0xff] %vm2774_vm7, %v2688_v4  ;;  %v2999_v47 = vadd.f32 %v2998_v11, %v2997_v40 }
 0x2d2   : > { %v2210_v24 = vld [vmem:[#allocation3 + $0x2f0] sm:$0xff] }
 0x2d3   : > { %v2691_v25 = vadd.f32 %v4559_v45, %v2999_v47  ;;  %v2258_v29 = vpack.c.bf16 %v2210_v24, %v2207_v60  ;;  %v2206_v62 = vld [vmem:[#allocation3 + $0x2d0] sm:$0xff] }
 0x2d5   : > { %2786 = vst.msk [vmem:[%s4473_s17 + $0x58] sm:$0xff] %vm2774_vm7, %v2691_v25  ;;  %2604 = vmatprep.mubr.bf16.mxu1 %v2258_v29  ;;  %v3000_v58 = vpop.f32.mrf.mxu1  ;;  %v3144_v25 = vpop.f32.mrf.mxu0 }
 0x2d6   : > { %v2209_v19 = vld [vmem:[#allocation3 + $0x2e8] sm:$0xff] }
 0x2d7   : > { %v2257_v0 = vpack.c.bf16 %v2209_v19, %v2206_v62  ;;  %v3001_v50 = vpop.f32.mrf.mxu1  ;;  %v2743_v29 = vpop.f32.mrf.mxu0 }
 0x2d8   : > { %v3002_v6 = vadd.f32 %v3001_v50, %v3000_v58 }
 0x2d9   : > { %2605 = vmatmul.mubr.bf16.gmra.mxu1 %v2257_v0  ;;  %v3003_v36 = vpop.f32.mrf.mxu1  ;;  %v3145_v19 = vpop.f32.mrf.mxu0 }
 0x2da   : > { %v2696_v34 = vadd.f32 %v3002_v6, %v2695_v43 }
 0x2db   : > { %v3004_v51 = vpop.f32.mrf.mxu1 }
 0x2dc   : > { %2787 = vst.msk [vmem:[%s4473_s17 + $0x60] sm:$0xff] %vm2774_vm7, %v2696_v34  ;;  %v3005_v54 = vadd.f32 %v3004_v51, %v3003_v36  ;;  %v2746_v36 = vpop.f32.mrf.mxu0 }
 0x2de   : > { %v2699_v22 = vadd.f32 %v3005_v54, %v2698_v56 }
 0x2e0   : > { %2788 = vst.msk [vmem:[%s4473_s17 + $0x68] sm:$0xff] %vm2774_vm7, %v2699_v22 }
 0x2fa   : > { %v3006_v41 = vpop.f32.mrf.mxu1 }
 0x2fc   : > { %v3007_v9 = vpop.f32.mrf.mxu1 }
 0x2fd   : > { %v3008_v8 = vadd.f32 %v3007_v9, %v3006_v41 }
 0x2fe   : > { %v3009_v31 = vpop.f32.mrf.mxu1 }
 0x2ff   : > { %v2704_v20 = vadd.f32 %v3132_v17, %v3008_v8 }
 0x300   : > { %v3010_v45 = vpop.f32.mrf.mxu1 }
 0x301   : > { %2789 = vst.msk [vmem:[%s4473_s17 + $0x70] sm:$0xff] %vm2774_vm7, %v2704_v20  ;;  %v3011_v18 = vadd.f32 %v3010_v45, %v3009_v31  ;;  %v3148_v20 = vpop.f32.mrf.mxu0 }
 0x303   : > { %v2707_v14 = vadd.f32 %v3133_v26, %v3011_v18  ;;  %v2759_v45 = vpop.f32.mrf.mxu0 }
 0x305   : > { %2790 = vst.msk [vmem:[%s4473_s17 + $0x78] sm:$0xff] %vm2774_vm7, %v2707_v14  ;;  %v3012_v13 = vpop.f32.mrf.mxu1  ;;  %v3149_v14 = vpop.f32.mrf.mxu0 }
 0x307   : > { %v3013_v10 = vpop.f32.mrf.mxu1 }
 0x308   : > { %v3014_v27 = vadd.f32 %v3013_v10, %v3012_v13 }
 0x309   : > { %v3015_v28 = vpop.f32.mrf.mxu1 }
 0x30a   : > { %v2712_v16 = vadd.f32 %v3014_v27, %v2711_v49 }
 0x30b   : > { %v3016_v35 = vpop.f32.mrf.mxu1 }
 0x30c   : > { %2791 = vst.msk [vmem:[%s4473_s17 + $0x80] sm:$0xff] %vm2774_vm7, %v2712_v16  ;;  %v3017_v46 = vadd.f32 %v3016_v35, %v3015_v28 }
 0x30e   : > { %v2715_v59 = vadd.f32 %v3017_v46, %v2714_v63 }
 0x310   : > { %2792 = vst.msk [vmem:[%s4473_s17 + $0x88] sm:$0xff] %vm2774_vm7, %v2715_v59 }
 0x31e   : > { %v3018_v30 = vpop.f32.mrf.mxu1 }
 0x320   : > { %v3019_v48 = vpop.f32.mrf.mxu1 }
 0x321   : > { %v3020_v42 = vadd.f32 %v3019_v48, %v3018_v30 }
 0x322   : > { %v3021_v3 = vpop.f32.mrf.mxu1 }
 0x323   : > { %v2720_v21 = vadd.f32 %v3136_v44, %v3020_v42 }
 0x324   : > { %v3022_v1 = vpop.f32.mrf.mxu1 }
 0x325   : > { %2793 = vst.msk [vmem:[%s4473_s17 + $0x90] sm:$0xff] %vm2774_vm7, %v2720_v21  ;;  %v3023_v32 = vadd.f32 %v3022_v1, %v3021_v3 }
 0x326   : > { %v3024_v55 = vpop.f32.mrf.mxu1 }
 0x327   : > { %v2723_v38 = vadd.f32 %v3137_v2, %v3023_v32  ;;  %v2762_v2 = vpop.f32.mrf.mxu0 }
 0x328   : > { %v3025_v23 = vpop.f32.mrf.mxu1 }
 0x329   : > { %2794 = vst.msk [vmem:[%s4473_s17 + $0x98] sm:$0xff] %vm2774_vm7, %v2723_v38  ;;  %v3026_v37 = vadd.f32 %v3025_v23, %v3024_v55 }
 0x32a   : > { %v3027_v12 = vpop.f32.mrf.mxu1 }
 0x32b   : > { %v2728_v57 = vadd.f32 %v3026_v37, %v2727_v52 }
 0x32c   : > { %v3028_v7 = vpop.f32.mrf.mxu1 }
 0x32d   : > { %2795 = vst.msk [vmem:[%s4473_s17 + $0xa0] sm:$0xff] %vm2774_vm7, %v2728_v57  ;;  %v3029_v53 = vadd.f32 %v3028_v7, %v3027_v12 }
 0x32f   : > { %v2731_v15 = vadd.f32 %v3029_v53, %v2730_v33 }
 0x331   : > { %2796 = vst.msk [vmem:[%s4473_s17 + $0xa8] sm:$0xff] %vm2774_vm7, %v2731_v15 }
 0x339   : > { %v3030_v39 = vpop.f32.mrf.mxu1 }
 0x33b   : > { %v3031_v40 = vpop.f32.mrf.mxu1 }
 0x33c   : > { %v3032_v4 = vadd.f32 %v3031_v40, %v3030_v39 }
 0x33d   : > { %v3033_v11 = vpop.f32.mrf.mxu1 }
 0x33e   : > { %v2736_v60 = vadd.f32 %v3140_v5, %v3032_v4 }
 0x33f   : > { %v3034_v47 = vpop.f32.mrf.mxu1 }
 0x340   : > { %2797 = vst.msk [vmem:[%s4473_s17 + $0xb0] sm:$0xff] %vm2774_vm7, %v2736_v60  ;;  %v3035_v17 = vadd.f32 %v3034_v47, %v3033_v11 }
 0x342   : > { %v2739_v24 = vadd.f32 %v3141_v61, %v3035_v17 }
 0x344   : > { %2798 = vst.msk [vmem:[%s4473_s17 + $0xb8] sm:$0xff] %vm2774_vm7, %v2739_v24 }
 0x351   : > { %v3036_v43 = vpop.f32.mrf.mxu1 }
 0x353   : > { %v3037_v58 = vpop.f32.mrf.mxu1 }
 0x354   : > { %v3038_v62 = vadd.f32 %v3037_v58, %v3036_v43 }
 0x355   : > { %v3039_v0 = vpop.f32.mrf.mxu1 }
 0x356   : > { %v2744_v50 = vadd.f32 %v3038_v62, %v2743_v29 }
 0x357   : > { %v3040_v6 = vpop.f32.mrf.mxu1 }
 0x358   : > { %2799 = vst.msk [vmem:[%s4473_s17 + $0xc0] sm:$0xff] %vm2774_vm7, %v2744_v50  ;;  %v3041_v26 = vadd.f32 %v3040_v6, %v3039_v0 }
 0x35a   : > { %v2747_v34 = vadd.f32 %v3041_v26, %v2746_v36 }
 0x35c   : > { %2800 = vst.msk [vmem:[%s4473_s17 + $0xc8] sm:$0xff] %vm2774_vm7, %v2747_v34 }
 0x369   : > { %v3042_v51 = vpop.f32.mrf.mxu1 }
 0x36b   : > { %v3043_v54 = vpop.f32.mrf.mxu1 }
 0x36c   : > { %v3044_v56 = vadd.f32 %v3043_v54, %v3042_v51 }
 0x36d   : > { %v3045_v22 = vpop.f32.mrf.mxu1 }
 0x36e   : > { %v2752_v41 = vadd.f32 %v3144_v25, %v3044_v56 }
 0x36f   : > { %v3046_v9 = vpop.f32.mrf.mxu1 }
 0x370   : > { %2801 = vst.msk [vmem:[%s4473_s17 + $0xd0] sm:$0xff] %vm2774_vm7, %v2752_v41  ;;  %v3047_v8 = vadd.f32 %v3046_v9, %v3045_v22 }
 0x372   : > { %v2755_v31 = vadd.f32 %v3145_v19, %v3047_v8 }
 0x374   : > { %2802 = vst.msk [vmem:[%s4473_s17 + $0xd8] sm:$0xff] %vm2774_vm7, %v2755_v31 }
 0x381   : > { %v3048_v18 = vpop.f32.mrf.mxu1 }
 0x383   : > { %v3049_v44 = vpop.f32.mrf.mxu1 }
 0x384   : > { %v3050_v49 = vadd.f32 %v3049_v44, %v3048_v18 }
 0x385   : > { %v3051_v13 = vpop.f32.mrf.mxu1 }
 0x386   : > { %v2760_v10 = vadd.f32 %v3050_v49, %v2759_v45 }
 0x387   : > { %v3052_v27 = vpop.f32.mrf.mxu1 }
 0x388   : > { %2803 = vst.msk [vmem:[%s4473_s17 + $0xe0] sm:$0xff] %vm2774_vm7, %v2760_v10  ;;  %v3053_v28 = vadd.f32 %v3052_v27, %v3051_v13 }
 0x38a   : > { %v2763_v16 = vadd.f32 %v3053_v28, %v2762_v2 }
 0x38c   : > { %2804 = vst.msk [vmem:[%s4473_s17 + $0xe8] sm:$0xff] %vm2774_vm7, %v2763_v16 }
 0x399   : > { %v3054_v35 = vpop.f32.mrf.mxu1 }
 0x39b   : > { %v3055_v46 = vpop.f32.mrf.mxu1 }
 0x39c   : > { %v3056_v63 = vadd.f32 %v3055_v46, %v3054_v35 }
 0x39d   : > { %v3057_v59 = vpop.f32.mrf.mxu1 }
 0x39e   : > { %v2768_v30 = vadd.f32 %v3148_v20, %v3056_v63 }
 0x39f   : > { %v3058_v48 = vpop.f32.mrf.mxu1 }
 0x3a0   : > { %2805 = vst.msk [vmem:[%s4473_s17 + $0xf0] sm:$0xff] %vm2774_vm7, %v2768_v30  ;;  %v3059_v42 = vadd.f32 %v3058_v48, %v3057_v59 }
 0x3a2   : > { %v2771_v5 = vadd.f32 %v3149_v14, %v3059_v42 }
 0x3a4   : > { %2806 = vst.msk [vmem:[%s4473_s17 + $0xf8] sm:$0xff] %vm2774_vm7, %v2771_v5 }
 0x3a5 PF: > { %s16_s21 = sadd.s32 1, %s3205_s21  }
 0x3a6   : > { %p13_p4 = scmp.ge.s32.totalorder %s16_s21, 4  }
 0x3a8   :  { %15 = sbr.rel (!%p13_p4) target bundleno = 1 (0x1), region = 76 }

</bundles_post_ra>
